<compile_context>
chip_gen: v5e
topology: v5e:2x2
jax: 0.10.0
libtpu: 0.0.40
codegen_flags: <defaults>
</compile_context>

<pallas_src>
import jax
import jax.numpy as jnp
import numpy as np
from jax import lax
from jax.experimental import pallas as pl
from jax.experimental.pallas import tpu as pltpu

LN_EPS = 1e-5  # PyTorch nn.LayerNorm default


def _expand_ln_rearrange_kernel(x_ref, w_ref, s_ref, stg_ref, b_ref, o_ref):
    """One (row-tile, batch) grid step.

    x_ref  : (1, tile_h*W, D)       input tokens for tile_h spatial rows (orig dtype)
    w_ref  : (D, C)                 group-CENTERED expand weight (mxu dtype), C = 16*D
    s_ref  : (C, 16)                group indicator S[ch, g] = (ch // D == g) (mxu dtype)
    stg_ref: (16, C)                S^T with gamma folded in: stg[g, ch] = gamma[ch%D]*(ch//D==g)
    b_ref  : (1, C)                 LayerNorm beta tiled 16x (f32)
    o_ref  : (1, tile_h*p, W, p*D)  normalized + rearranged output tile
    """
    _, PH, W, PD = o_ref.shape
    D = x_ref.shape[-1]
    C = w_ref.shape[1]
    p = PD // D
    tile_h = PH // p
    mxu_dtype = w_ref.dtype

    # Cast the input tile to the MXU dtype in VMEM (bf16 by default).
    x = x_ref[0].astype(mxu_dtype)                                    # (tL, D)

    # Expand matmul with the centered weight: ycen = x @ W - group_mean(x @ W).
    ycen = jnp.dot(x, w_ref[...], preferred_element_type=jnp.float32)  # (tL, C) f32

    # Group variance = centered second moment (lane-dense, one MXU reduction).
    inv_d = 1.0 / D
    ysq = (ycen * ycen).astype(mxu_dtype)                             # (tL, C)
    var = jnp.dot(ysq, s_ref[...], preferred_element_type=jnp.float32) * inv_d  # (tL, 16)
    inv = lax.rsqrt(var + LN_EPS)                                     # EUP, tiny tensor

    # Single stat broadcast with gamma folded in: scale[:, ch] = inv[:, ch//D] * gamma[ch%D].
    scale = jnp.dot(inv.astype(mxu_dtype), stg_ref[...],
                    preferred_element_type=jnp.float32)               # (tL, C)

    out = (ycen * scale + b_ref[...]).astype(o_ref.dtype)             # (tL, C)

    # Fused rearrange 'h w (p1 p2 c) -> (h p1) w (p2 c)':
    #   token (ih, w), channel (p1, p2, c) -> o_ref[0, ih*p + p1, w, p2*D + c].
    # Row slices start at multiples of W (sublane-aligned when W % 8 == 0) and
    # column slices at multiples of PD (lane-aligned when PD % 128 == 0), so
    # each store is an aligned vreg copy.
    for ih in range(tile_h):
        for p1 in range(p):
            o_ref[0, ih * p + p1, :, :] = out[ih * W:(ih + 1) * W,
                                              p1 * PD:(p1 + 1) * PD]


def _vmem_estimate(tile_h, W, D, C, x_bytes, mxu_bytes, out_bytes):
    """Rough per-grid-step VMEM footprint (double-buffered blocks + live temps)."""
    tL = tile_h * W
    blocks = 2 * tL * D * x_bytes          # x block (double-buffered)
    blocks += 2 * tL * C * out_bytes       # output block (double-buffered)
    blocks += 2 * D * C * mxu_bytes        # centered weight
    blocks += 2 * (2 * 16 * C) * mxu_bytes + C * 4   # S, S^T*gamma, beta
    temps = tL * D * mxu_bytes                       # in-kernel x cast
    temps += tL * C * (4 + mxu_bytes + 4 + 4)        # ycen f32, ysq, scale f32, out f32
    return blocks + temps + (1 << 20)                # ~1 MiB compiler slack


def final_patch_expand_x4(x, weight, gamma, beta, input_resolution, dim,
                          dim_scale=4, *, tile_h=None,
                          mxu_dtype=jnp.bfloat16, out_dtype=None,
                          vmem_budget_bytes=24 * 1024 * 1024,
                          vmem_limit_bytes=None):
    """x: (B, H*W, dim) -> (B, (H*dim_scale)*(W*dim_scale), dim)

    weight: (16*dim, dim)  -- PyTorch nn.Linear weight layout (out, in)
    gamma, beta: (dim,)
    mxu_dtype: matmul input dtype (jnp.bfloat16 default; pass jnp.float32 for a
               strict-precision path).  LayerNorm statistics math stays f32.
    out_dtype: output dtype (default: x.dtype).  bf16 halves the 16x HBM write.
    """
    H, W = input_resolution
    B, L, D = x.shape
    assert L == H * W, "input feature has wrong size"
    assert D == dim
    p = dim_scale
    C = p * p * dim
    PD = p * dim
    if mxu_dtype is None:
        mxu_dtype = jnp.float32
    if out_dtype is None:
        out_dtype = x.dtype

    x_bytes = jnp.dtype(x.dtype).itemsize
    mxu_bytes = jnp.dtype(mxu_dtype).itemsize
    out_bytes = jnp.dtype(out_dtype).itemsize

    # Largest row-tile dividing H whose *real* per-step footprint fits the budget.
    if tile_h is None:
        tile_h = 1
        for t in range(1, H + 1):
            if H % t == 0 and _vmem_estimate(t, W, D, C, x_bytes, mxu_bytes,
                                             out_bytes) <= vmem_budget_bytes:
                tile_h = t
    assert H % tile_h == 0
    tL = tile_h * W

    est = _vmem_estimate(tile_h, W, D, C, x_bytes, mxu_bytes, out_bytes)
    if vmem_limit_bytes is None:
        # Conservative by default (fits v7x's 64 MiB VMEM); only grows past
        # ~48 MiB if the caller raises vmem_budget_bytes on v5e/v6e.
        vmem_limit_bytes = int(min(96 * 1024 * 1024, max(32 * 1024 * 1024, 2 * est)))

    # --- Host-side weight / constant prep (all small, one-time per call) -----
    w_t = weight.T.astype(jnp.float32)                    # (D, C), in x out
    w_grp = w_t.reshape(D, p * p, D)
    w_c = (w_grp - jnp.mean(w_grp, axis=-1, keepdims=True)).reshape(D, C)
    w_c = w_c.astype(mxu_dtype)                           # centered weight

    groups = jnp.arange(C, dtype=jnp.int32) // dim
    S = (groups[:, None] == jnp.arange(p * p, dtype=jnp.int32)[None, :]
         ).astype(jnp.float32)                            # (C, 16)
    gamma_t = jnp.tile(gamma.astype(jnp.float32), p * p)  # (C,)
    StG = (S.T * gamma_t[None, :]).astype(mxu_dtype)      # (16, C), gamma folded
    S = S.astype(mxu_dtype)
    beta_t = jnp.tile(beta.astype(jnp.float32), p * p).reshape(1, C)

    grid = (H // tile_h, B)

    cost = pl.CostEstimate(
        flops=int(2 * B * L * D * C           # expand matmul (centered weight)
                  + 2 * B * L * C * (p * p)   # centered second moment
                  + 2 * B * L * (p * p) * C   # gamma*inv broadcast
                  + 4 * B * L * C),           # elementwise
        transcendentals=int(B * L * p * p),
        bytes_accessed=int(B * L * D * x_bytes
                           + D * C * mxu_bytes
                           + (2 * 16 * C) * mxu_bytes + C * 4
                           + B * L * C * out_bytes),
    )

    y4 = pl.pallas_call(
        _expand_ln_rearrange_kernel,
        out_shape=jax.ShapeDtypeStruct((B, H * p, W, PD), out_dtype),
        grid=grid,
        in_specs=[
            pl.BlockSpec((1, tL, D), lambda h, b: (b, h, 0)),
            pl.BlockSpec((D, C), lambda h, b: (0, 0)),
            pl.BlockSpec((C, p * p), lambda h, b: (0, 0)),
            pl.BlockSpec((p * p, C), lambda h, b: (0, 0)),
            pl.BlockSpec((1, C), lambda h, b: (0, 0)),
        ],
        out_specs=pl.BlockSpec((1, tile_h * p, W, PD), lambda h, b: (b, h, 0, 0)),
        compiler_params=pltpu.CompilerParams(
            dimension_semantics=("parallel", "parallel"),
            vmem_limit_bytes=vmem_limit_bytes),
        cost_estimate=cost,
    )(x, w_c, S, StG, beta_t)

    # (B, H*p, W, p*dim) -> (B, (H*p)*(W*p), dim) is a pure row-major reshape
    # (metadata-only); the rearrange already happened inside the kernel.
    return y4.reshape(B, H * p * W * p, dim)


def reference(x, weight, gamma, beta, input_resolution, dim, dim_scale=4):
    """Pure-JAX reference mirroring the PyTorch forward."""
    H, W = input_resolution
    B, L, _ = x.shape
    p = dim_scale
    y = jnp.einsum("blc,oc->blo", x, weight)          # Linear, no bias
    y = y.reshape(B, H, W, p, p, dim)
    y = jnp.transpose(y, (0, 1, 3, 2, 4, 5)).reshape(B, H * p * W * p, dim)
    mean = jnp.mean(y, axis=-1, keepdims=True)
    var = jnp.mean((y - mean) ** 2, axis=-1, keepdims=True)
    y = (y - mean) / jnp.sqrt(var + LN_EPS)
    return y * gamma + beta


if __name__ == "__main__":
    B, H, W, dim = 2, 8, 8, 32
    key = jax.random.PRNGKey(0)
    kx, kw, kg, kb = jax.random.split(key, 4)

    x = jax.random.normal(kx, (B, H * W, dim), dtype=jnp.float32)
    weight = jax.random.normal(kw, (16 * dim, dim), dtype=jnp.float32) * 0.02
    gamma = 1.0 + 0.1 * jax.random.normal(kg, (dim,), dtype=jnp.float32)
    beta = 0.1 * jax.random.normal(kb, (dim,), dtype=jnp.float32)

    ref = reference(x, weight, gamma, beta, (H, W), dim)

    # 1) Default fast path: bf16 MXU inputs (LayerNorm stats in f32).
    out = jax.block_until_ready(
        final_patch_expand_x4(x, weight, gamma, beta, (H, W), dim))
    assert out.shape == (B, 16 * H * W, dim)
    np.testing.assert_allclose(np.asarray(out), np.asarray(ref),
                               rtol=3e-2, atol=2e-2)

    # 2) Strict f32 MXU path, multi-tile grid (exercises grid=(H//tile_h, B)).
    out2 = jax.block_until_ready(
        final_patch_expand_x4(x, weight, gamma, beta, (H, W), dim,
                              mxu_dtype=jnp.float32, tile_h=2))
    np.testing.assert_allclose(np.asarray(out2), np.asarray(ref),
                               rtol=5e-3, atol=5e-3)

    # 3) bf16 output path (halves the 16x-expanded HBM write).
    out3 = jax.block_until_ready(
        final_patch_expand_x4(x, weight, gamma, beta, (H, W), dim,
                              out_dtype=jnp.bfloat16))
    assert out3.dtype == jnp.bfloat16
    np.testing.assert_allclose(np.asarray(jnp.asarray(out3, jnp.float32)),
                               np.asarray(ref), rtol=6e-2, atol=3e-2)

    print("KERNEL_OK")
</pallas_src>

<mosaic_0001>
module attributes {stable_mosaic.version = 11 : i64} {
  func.func @_expand_ln_rearrange_kernel(%arg0: i32, %arg1: i32, %arg2: memref<1x64x32xf32, #tpu.memory_space<vmem>>, %arg3: memref<32x512xbf16, #tpu.memory_space<vmem>>, %arg4: memref<512x16xbf16, #tpu.memory_space<vmem>>, %arg5: memref<16x512xbf16, #tpu.memory_space<vmem>>, %arg6: memref<1x512xf32, #tpu.memory_space<vmem>>, %arg7: memref<1x32x8x128xf32, #tpu.memory_space<vmem>>) attributes {dimension_semantics = [#tpu.dimension_semantics<parallel>, #tpu.dimension_semantics<parallel>], iteration_bounds = array<i64: 1, 2>, scalar_prefetch = 0 : i64, scratch_operands = 0 : i64, tpu.core_type = #tpu.core_type<tc>, window_params = [{transform_indices = @transform_0, window_bounds = array<i64: 1, 64, 32>}, {pipeline_mode = #tpu.pipeline_mode<synchronous>, transform_indices = @transform_1, window_bounds = array<i64: 32, 512>}, {pipeline_mode = #tpu.pipeline_mode<synchronous>, transform_indices = @transform_2, window_bounds = array<i64: 512, 16>}, {pipeline_mode = #tpu.pipeline_mode<synchronous>, transform_indices = @transform_3, window_bounds = array<i64: 16, 512>}, {pipeline_mode = #tpu.pipeline_mode<synchronous>, transform_indices = @transform_4, window_bounds = array<i64: 1, 512>}, {transform_indices = @transform_5, window_bounds = array<i64: 1, 32, 8, 128>}]} {
    %c0 = arith.constant 0 : index
    %c0_0 = arith.constant 0 : index
    %c0_1 = arith.constant 0 : index
    %0 = vector.load %arg2[%c0, %c0_0, %c0_1] : memref<1x64x32xf32, #tpu.memory_space<vmem>>, vector<1x64x32xf32>
    %1 = vector.shape_cast %0 : vector<1x64x32xf32> to vector<64x32xf32>
    %2 = arith.truncf %1 : vector<64x32xf32> to vector<64x32xbf16>
    %c0_2 = arith.constant 0 : index
    %c0_3 = arith.constant 0 : index
    %3 = vector.load %arg3[%c0_2, %c0_3] : memref<32x512xbf16, #tpu.memory_space<vmem>>, vector<32x512xbf16>
    %cst = arith.constant dense<0.000000e+00> : vector<64x512xf32>
    %4 = tpu.matmul %2, %3, %cst {dimension_numbers = #tpu.dot_dimension_numbers<[1], [0], [0], [1], [0, 0, 1, 1], [], []>} : vector<64x32xbf16>, vector<32x512xbf16>, vector<64x512xf32> -> vector<64x512xf32>
    %5 = arith.mulf %4, %4 : vector<64x512xf32>
    %6 = arith.truncf %5 : vector<64x512xf32> to vector<64x512xbf16>
    %c0_4 = arith.constant 0 : index
    %c0_5 = arith.constant 0 : index
    %7 = vector.load %arg4[%c0_4, %c0_5] : memref<512x16xbf16, #tpu.memory_space<vmem>>, vector<512x16xbf16>
    %cst_6 = arith.constant dense<0.000000e+00> : vector<64x16xf32>
    %8 = tpu.matmul %6, %7, %cst_6 {dimension_numbers = #tpu.dot_dimension_numbers<[1], [0], [0], [1], [0, 0, 1, 1], [], []>} : vector<64x512xbf16>, vector<512x16xbf16>, vector<64x16xf32> -> vector<64x16xf32>
    %cst_7 = arith.constant 3.125000e-02 : f32
    %9 = vector.broadcast %cst_7 : f32 to vector<64x16xf32>
    %10 = arith.mulf %8, %9 : vector<64x16xf32>
    %cst_8 = arith.constant 9.99999974E-6 : f32
    %11 = vector.broadcast %cst_8 : f32 to vector<64x16xf32>
    %12 = arith.addf %10, %11 : vector<64x16xf32>
    %13 = math.rsqrt %12 : vector<64x16xf32>
    %14 = arith.truncf %13 : vector<64x16xf32> to vector<64x16xbf16>
    %c0_9 = arith.constant 0 : index
    %c0_10 = arith.constant 0 : index
    %15 = vector.load %arg5[%c0_9, %c0_10] : memref<16x512xbf16, #tpu.memory_space<vmem>>, vector<16x512xbf16>
    %cst_11 = arith.constant dense<0.000000e+00> : vector<64x512xf32>
    %16 = tpu.matmul %14, %15, %cst_11 {dimension_numbers = #tpu.dot_dimension_numbers<[1], [0], [0], [1], [0, 0, 1, 1], [], []>} : vector<64x16xbf16>, vector<16x512xbf16>, vector<64x512xf32> -> vector<64x512xf32>
    %17 = arith.mulf %4, %16 : vector<64x512xf32>
    %c0_12 = arith.constant 0 : index
    %c0_13 = arith.constant 0 : index
    %18 = vector.load %arg6[%c0_12, %c0_13] : memref<1x512xf32, #tpu.memory_space<vmem>>, vector<1x512xf32>
    %19 = vector.broadcast %18 : vector<1x512xf32> to vector<64x512xf32>
    %20 = arith.addf %17, %19 : vector<64x512xf32>
    %21 = vector.extract_strided_slice %20 {offsets = [0, 0], sizes = [8, 128], strides = [1, 1]} : vector<64x512xf32> to vector<8x128xf32>
    %c0_14 = arith.constant 0 : index
    %c0_15 = arith.constant 0 : index
    %c0_16 = arith.constant 0 : index
    %c0_17 = arith.constant 0 : index
    %22 = vector.load %arg7[%c0_14, %c0_15, %c0_16, %c0_17] : memref<1x32x8x128xf32, #tpu.memory_space<vmem>>, vector<1x1x8x128xf32>
    %23 = vector.shape_cast %22 : vector<1x1x8x128xf32> to vector<8x128xf32>
    %24 = vector.shape_cast %21 : vector<8x128xf32> to vector<1x1x8x128xf32>
    tpu.vector_store %arg7[%c0_14, %c0_15, %c0_16, %c0_17], %24 {strides = array<i32>} : memref<1x32x8x128xf32, #tpu.memory_space<vmem>>, vector<1x1x8x128xf32>,
    %25 = vector.extract_strided_slice %20 {offsets = [0, 128], sizes = [8, 128], strides = [1, 1]} : vector<64x512xf32> to vector<8x128xf32>
    %c0_18 = arith.constant 0 : index
    %c1 = arith.constant 1 : index
    %c0_19 = arith.constant 0 : index
    %c0_20 = arith.constant 0 : index
    %26 = vector.load %arg7[%c0_18, %c1, %c0_19, %c0_20] : memref<1x32x8x128xf32, #tpu.memory_space<vmem>>, vector<1x1x8x128xf32>
    %27 = vector.shape_cast %26 : vector<1x1x8x128xf32> to vector<8x128xf32>
    %28 = vector.shape_cast %25 : vector<8x128xf32> to vector<1x1x8x128xf32>
    tpu.vector_store %arg7[%c0_18, %c1, %c0_19, %c0_20], %28 {strides = array<i32>} : memref<1x32x8x128xf32, #tpu.memory_space<vmem>>, vector<1x1x8x128xf32>,
    %29 = vector.extract_strided_slice %20 {offsets = [0, 256], sizes = [8, 128], strides = [1, 1]} : vector<64x512xf32> to vector<8x128xf32>
    %c0_21 = arith.constant 0 : index
    %c2 = arith.constant 2 : index
    %c0_22 = arith.constant 0 : index
    %c0_23 = arith.constant 0 : index
    %30 = vector.load %arg7[%c0_21, %c2, %c0_22, %c0_23] : memref<1x32x8x128xf32, #tpu.memory_space<vmem>>, vector<1x1x8x128xf32>
    %31 = vector.shape_cast %30 : vector<1x1x8x128xf32> to vector<8x128xf32>
    %32 = vector.shape_cast %29 : vector<8x128xf32> to vector<1x1x8x128xf32>
    tpu.vector_store %arg7[%c0_21, %c2, %c0_22, %c0_23], %32 {strides = array<i32>} : memref<1x32x8x128xf32, #tpu.memory_space<vmem>>, vector<1x1x8x128xf32>,
    %33 = vector.extract_strided_slice %20 {offsets = [0, 384], sizes = [8, 128], strides = [1, 1]} : vector<64x512xf32> to vector<8x128xf32>
    %c0_24 = arith.constant 0 : index
    %c3 = arith.constant 3 : index
    %c0_25 = arith.constant 0 : index
    %c0_26 = arith.constant 0 : index
    %34 = vector.load %arg7[%c0_24, %c3, %c0_25, %c0_26] : memref<1x32x8x128xf32, #tpu.memory_space<vmem>>, vector<1x1x8x128xf32>
    %35 = vector.shape_cast %34 : vector<1x1x8x128xf32> to vector<8x128xf32>
    %36 = vector.shape_cast %33 : vector<8x128xf32> to vector<1x1x8x128xf32>
    tpu.vector_store %arg7[%c0_24, %c3, %c0_25, %c0_26], %36 {strides = array<i32>} : memref<1x32x8x128xf32, #tpu.memory_space<vmem>>, vector<1x1x8x128xf32>,
    %37 = vector.extract_strided_slice %20 {offsets = [8, 0], sizes = [8, 128], strides = [1, 1]} : vector<64x512xf32> to vector<8x128xf32>
    %c0_27 = arith.constant 0 : index
    %c4 = arith.constant 4 : index
    %c0_28 = arith.constant 0 : index
    %c0_29 = arith.constant 0 : index
    %38 = vector.load %arg7[%c0_27, %c4, %c0_28, %c0_29] : memref<1x32x8x128xf32, #tpu.memory_space<vmem>>, vector<1x1x8x128xf32>
    %39 = vector.shape_cast %38 : vector<1x1x8x128xf32> to vector<8x128xf32>
    %40 = vector.shape_cast %37 : vector<8x128xf32> to vector<1x1x8x128xf32>
    tpu.vector_store %arg7[%c0_27, %c4, %c0_28, %c0_29], %40 {strides = array<i32>} : memref<1x32x8x128xf32, #tpu.memory_space<vmem>>, vector<1x1x8x128xf32>,
    %41 = vector.extract_strided_slice %20 {offsets = [8, 128], sizes = [8, 128], strides = [1, 1]} : vector<64x512xf32> to vector<8x128xf32>
    %c0_30 = arith.constant 0 : index
    %c5 = arith.constant 5 : index
    %c0_31 = arith.constant 0 : index
    %c0_32 = arith.constant 0 : index
    %42 = vector.load %arg7[%c0_30, %c5, %c0_31, %c0_32] : memref<1x32x8x128xf32, #tpu.memory_space<vmem>>, vector<1x1x8x128xf32>
    %43 = vector.shape_cast %42 : vector<1x1x8x128xf32> to vector<8x128xf32>
    %44 = vector.shape_cast %41 : vector<8x128xf32> to vector<1x1x8x128xf32>
    tpu.vector_store %arg7[%c0_30, %c5, %c0_31, %c0_32], %44 {strides = array<i32>} : memref<1x32x8x128xf32, #tpu.memory_space<vmem>>, vector<1x1x8x128xf32>,
    %45 = vector.extract_strided_slice %20 {offsets = [8, 256], sizes = [8, 128], strides = [1, 1]} : vector<64x512xf32> to vector<8x128xf32>
    %c0_33 = arith.constant 0 : index
    %c6 = arith.constant 6 : index
    %c0_34 = arith.constant 0 : index
    %c0_35 = arith.constant 0 : index
    %46 = vector.load %arg7[%c0_33, %c6, %c0_34, %c0_35] : memref<1x32x8x128xf32, #tpu.memory_space<vmem>>, vector<1x1x8x128xf32>
    %47 = vector.shape_cast %46 : vector<1x1x8x128xf32> to vector<8x128xf32>
    %48 = vector.shape_cast %45 : vector<8x128xf32> to vector<1x1x8x128xf32>
    tpu.vector_store %arg7[%c0_33, %c6, %c0_34, %c0_35], %48 {strides = array<i32>} : memref<1x32x8x128xf32, #tpu.memory_space<vmem>>, vector<1x1x8x128xf32>,
    %49 = vector.extract_strided_slice %20 {offsets = [8, 384], sizes = [8, 128], strides = [1, 1]} : vector<64x512xf32> to vector<8x128xf32>
    %c0_36 = arith.constant 0 : index
    %c7 = arith.constant 7 : index
    %c0_37 = arith.constant 0 : index
    %c0_38 = arith.constant 0 : index
    %50 = vector.load %arg7[%c0_36, %c7, %c0_37, %c0_38] : memref<1x32x8x128xf32, #tpu.memory_space<vmem>>, vector<1x1x8x128xf32>
    %51 = vector.shape_cast %50 : vector<1x1x8x128xf32> to vector<8x128xf32>
    %52 = vector.shape_cast %49 : vector<8x128xf32> to vector<1x1x8x128xf32>
    tpu.vector_store %arg7[%c0_36, %c7, %c0_37, %c0_38], %52 {strides = array<i32>} : memref<1x32x8x128xf32, #tpu.memory_space<vmem>>, vector<1x1x8x128xf32>,
    %53 = vector.extract_strided_slice %20 {offsets = [16, 0], sizes = [8, 128], strides = [1, 1]} : vector<64x512xf32> to vector<8x128xf32>
    %c0_39 = arith.constant 0 : index
    %c8 = arith.constant 8 : index
    %c0_40 = arith.constant 0 : index
    %c0_41 = arith.constant 0 : index
    %54 = vector.load %arg7[%c0_39, %c8, %c0_40, %c0_41] : memref<1x32x8x128xf32, #tpu.memory_space<vmem>>, vector<1x1x8x128xf32>
    %55 = vector.shape_cast %54 : vector<1x1x8x128xf32> to vector<8x128xf32>
    %56 = vector.shape_cast %53 : vector<8x128xf32> to vector<1x1x8x128xf32>
    tpu.vector_store %arg7[%c0_39, %c8, %c0_40, %c0_41], %56 {strides = array<i32>} : memref<1x32x8x128xf32, #tpu.memory_space<vmem>>, vector<1x1x8x128xf32>,
    %57 = vector.extract_strided_slice %20 {offsets = [16, 128], sizes = [8, 128], strides = [1, 1]} : vector<64x512xf32> to vector<8x128xf32>
    %c0_42 = arith.constant 0 : index
    %c9 = arith.constant 9 : index
    %c0_43 = arith.constant 0 : index
    %c0_44 = arith.constant 0 : index
    %58 = vector.load %arg7[%c0_42, %c9, %c0_43, %c0_44] : memref<1x32x8x128xf32, #tpu.memory_space<vmem>>, vector<1x1x8x128xf32>
    %59 = vector.shape_cast %58 : vector<1x1x8x128xf32> to vector<8x128xf32>
    %60 = vector.shape_cast %57 : vector<8x128xf32> to vector<1x1x8x128xf32>
    tpu.vector_store %arg7[%c0_42, %c9, %c0_43, %c0_44], %60 {strides = array<i32>} : memref<1x32x8x128xf32, #tpu.memory_space<vmem>>, vector<1x1x8x128xf32>,
    %61 = vector.extract_strided_slice %20 {offsets = [16, 256], sizes = [8, 128], strides = [1, 1]} : vector<64x512xf32> to vector<8x128xf32>
    %c0_45 = arith.constant 0 : index
    %c10 = arith.constant 10 : index
    %c0_46 = arith.constant 0 : index
    %c0_47 = arith.constant 0 : index
    %62 = vector.load %arg7[%c0_45, %c10, %c0_46, %c0_47] : memref<1x32x8x128xf32, #tpu.memory_space<vmem>>, vector<1x1x8x128xf32>
    %63 = vector.shape_cast %62 : vector<1x1x8x128xf32> to vector<8x128xf32>
    %64 = vector.shape_cast %61 : vector<8x128xf32> to vector<1x1x8x128xf32>
    tpu.vector_store %arg7[%c0_45, %c10, %c0_46, %c0_47], %64 {strides = array<i32>} : memref<1x32x8x128xf32, #tpu.memory_space<vmem>>, vector<1x1x8x128xf32>,
    %65 = vector.extract_strided_slice %20 {offsets = [16, 384], sizes = [8, 128], strides = [1, 1]} : vector<64x512xf32> to vector<8x128xf32>
    %c0_48 = arith.constant 0 : index
    %c11 = arith.constant 11 : index
    %c0_49 = arith.constant 0 : index
    %c0_50 = arith.constant 0 : index
    %66 = vector.load %arg7[%c0_48, %c11, %c0_49, %c0_50] : memref<1x32x8x128xf32, #tpu.memory_space<vmem>>, vector<1x1x8x128xf32>
    %67 = vector.shape_cast %66 : vector<1x1x8x128xf32> to vector<8x128xf32>
    %68 = vector.shape_cast %65 : vector<8x128xf32> to vector<1x1x8x128xf32>
    tpu.vector_store %arg7[%c0_48, %c11, %c0_49, %c0_50], %68 {strides = array<i32>} : memref<1x32x8x128xf32, #tpu.memory_space<vmem>>, vector<1x1x8x128xf32>,
    %69 = vector.extract_strided_slice %20 {offsets = [24, 0], sizes = [8, 128], strides = [1, 1]} : vector<64x512xf32> to vector<8x128xf32>
    %c0_51 = arith.constant 0 : index
    %c12 = arith.constant 12 : index
    %c0_52 = arith.constant 0 : index
    %c0_53 = arith.constant 0 : index
    %70 = vector.load %arg7[%c0_51, %c12, %c0_52, %c0_53] : memref<1x32x8x128xf32, #tpu.memory_space<vmem>>, vector<1x1x8x128xf32>
    %71 = vector.shape_cast %70 : vector<1x1x8x128xf32> to vector<8x128xf32>
    %72 = vector.shape_cast %69 : vector<8x128xf32> to vector<1x1x8x128xf32>
    tpu.vector_store %arg7[%c0_51, %c12, %c0_52, %c0_53], %72 {strides = array<i32>} : memref<1x32x8x128xf32, #tpu.memory_space<vmem>>, vector<1x1x8x128xf32>,
    %73 = vector.extract_strided_slice %20 {offsets = [24, 128], sizes = [8, 128], strides = [1, 1]} : vector<64x512xf32> to vector<8x128xf32>
    %c0_54 = arith.constant 0 : index
    %c13 = arith.constant 13 : index
    %c0_55 = arith.constant 0 : index
    %c0_56 = arith.constant 0 : index
    %74 = vector.load %arg7[%c0_54, %c13, %c0_55, %c0_56] : memref<1x32x8x128xf32, #tpu.memory_space<vmem>>, vector<1x1x8x128xf32>
    %75 = vector.shape_cast %74 : vector<1x1x8x128xf32> to vector<8x128xf32>
    %76 = vector.shape_cast %73 : vector<8x128xf32> to vector<1x1x8x128xf32>
    tpu.vector_store %arg7[%c0_54, %c13, %c0_55, %c0_56], %76 {strides = array<i32>} : memref<1x32x8x128xf32, #tpu.memory_space<vmem>>, vector<1x1x8x128xf32>,
    %77 = vector.extract_strided_slice %20 {offsets = [24, 256], sizes = [8, 128], strides = [1, 1]} : vector<64x512xf32> to vector<8x128xf32>
    %c0_57 = arith.constant 0 : index
    %c14 = arith.constant 14 : index
    %c0_58 = arith.constant 0 : index
    %c0_59 = arith.constant 0 : index
    %78 = vector.load %arg7[%c0_57, %c14, %c0_58, %c0_59] : memref<1x32x8x128xf32, #tpu.memory_space<vmem>>, vector<1x1x8x128xf32>
    %79 = vector.shape_cast %78 : vector<1x1x8x128xf32> to vector<8x128xf32>
    %80 = vector.shape_cast %77 : vector<8x128xf32> to vector<1x1x8x128xf32>
    tpu.vector_store %arg7[%c0_57, %c14, %c0_58, %c0_59], %80 {strides = array<i32>} : memref<1x32x8x128xf32, #tpu.memory_space<vmem>>, vector<1x1x8x128xf32>,
    %81 = vector.extract_strided_slice %20 {offsets = [24, 384], sizes = [8, 128], strides = [1, 1]} : vector<64x512xf32> to vector<8x128xf32>
    %c0_60 = arith.constant 0 : index
    %c15 = arith.constant 15 : index
    %c0_61 = arith.constant 0 : index
    %c0_62 = arith.constant 0 : index
    %82 = vector.load %arg7[%c0_60, %c15, %c0_61, %c0_62] : memref<1x32x8x128xf32, #tpu.memory_space<vmem>>, vector<1x1x8x128xf32>
    %83 = vector.shape_cast %82 : vector<1x1x8x128xf32> to vector<8x128xf32>
    %84 = vector.shape_cast %81 : vector<8x128xf32> to vector<1x1x8x128xf32>
    tpu.vector_store %arg7[%c0_60, %c15, %c0_61, %c0_62], %84 {strides = array<i32>} : memref<1x32x8x128xf32, #tpu.memory_space<vmem>>, vector<1x1x8x128xf32>,
    %85 = vector.extract_strided_slice %20 {offsets = [32, 0], sizes = [8, 128], strides = [1, 1]} : vector<64x512xf32> to vector<8x128xf32>
    %c0_63 = arith.constant 0 : index
    %c16 = arith.constant 16 : index
    %c0_64 = arith.constant 0 : index
    %c0_65 = arith.constant 0 : index
    %86 = vector.load %arg7[%c0_63, %c16, %c0_64, %c0_65] : memref<1x32x8x128xf32, #tpu.memory_space<vmem>>, vector<1x1x8x128xf32>
    %87 = vector.shape_cast %86 : vector<1x1x8x128xf32> to vector<8x128xf32>
    %88 = vector.shape_cast %85 : vector<8x128xf32> to vector<1x1x8x128xf32>
    tpu.vector_store %arg7[%c0_63, %c16, %c0_64, %c0_65], %88 {strides = array<i32>} : memref<1x32x8x128xf32, #tpu.memory_space<vmem>>, vector<1x1x8x128xf32>,
    %89 = vector.extract_strided_slice %20 {offsets = [32, 128], sizes = [8, 128], strides = [1, 1]} : vector<64x512xf32> to vector<8x128xf32>
    %c0_66 = arith.constant 0 : index
    %c17 = arith.constant 17 : index
    %c0_67 = arith.constant 0 : index
    %c0_68 = arith.constant 0 : index
    %90 = vector.load %arg7[%c0_66, %c17, %c0_67, %c0_68] : memref<1x32x8x128xf32, #tpu.memory_space<vmem>>, vector<1x1x8x128xf32>
    %91 = vector.shape_cast %90 : vector<1x1x8x128xf32> to vector<8x128xf32>
    %92 = vector.shape_cast %89 : vector<8x128xf32> to vector<1x1x8x128xf32>
    tpu.vector_store %arg7[%c0_66, %c17, %c0_67, %c0_68], %92 {strides = array<i32>} : memref<1x32x8x128xf32, #tpu.memory_space<vmem>>, vector<1x1x8x128xf32>,
    %93 = vector.extract_strided_slice %20 {offsets = [32, 256], sizes = [8, 128], strides = [1, 1]} : vector<64x512xf32> to vector<8x128xf32>
    %c0_69 = arith.constant 0 : index
    %c18 = arith.constant 18 : index
    %c0_70 = arith.constant 0 : index
    %c0_71 = arith.constant 0 : index
    %94 = vector.load %arg7[%c0_69, %c18, %c0_70, %c0_71] : memref<1x32x8x128xf32, #tpu.memory_space<vmem>>, vector<1x1x8x128xf32>
    %95 = vector.shape_cast %94 : vector<1x1x8x128xf32> to vector<8x128xf32>
    %96 = vector.shape_cast %93 : vector<8x128xf32> to vector<1x1x8x128xf32>
    tpu.vector_store %arg7[%c0_69, %c18, %c0_70, %c0_71], %96 {strides = array<i32>} : memref<1x32x8x128xf32, #tpu.memory_space<vmem>>, vector<1x1x8x128xf32>,
    %97 = vector.extract_strided_slice %20 {offsets = [32, 384], sizes = [8, 128], strides = [1, 1]} : vector<64x512xf32> to vector<8x128xf32>
    %c0_72 = arith.constant 0 : index
    %c19 = arith.constant 19 : index
    %c0_73 = arith.constant 0 : index
    %c0_74 = arith.constant 0 : index
    %98 = vector.load %arg7[%c0_72, %c19, %c0_73, %c0_74] : memref<1x32x8x128xf32, #tpu.memory_space<vmem>>, vector<1x1x8x128xf32>
    %99 = vector.shape_cast %98 : vector<1x1x8x128xf32> to vector<8x128xf32>
    %100 = vector.shape_cast %97 : vector<8x128xf32> to vector<1x1x8x128xf32>
    tpu.vector_store %arg7[%c0_72, %c19, %c0_73, %c0_74], %100 {strides = array<i32>} : memref<1x32x8x128xf32, #tpu.memory_space<vmem>>, vector<1x1x8x128xf32>,
    %101 = vector.extract_strided_slice %20 {offsets = [40, 0], sizes = [8, 128], strides = [1, 1]} : vector<64x512xf32> to vector<8x128xf32>
    %c0_75 = arith.constant 0 : index
    %c20 = arith.constant 20 : index
    %c0_76 = arith.constant 0 : index
    %c0_77 = arith.constant 0 : index
    %102 = vector.load %arg7[%c0_75, %c20, %c0_76, %c0_77] : memref<1x32x8x128xf32, #tpu.memory_space<vmem>>, vector<1x1x8x128xf32>
    %103 = vector.shape_cast %102 : vector<1x1x8x128xf32> to vector<8x128xf32>
    %104 = vector.shape_cast %101 : vector<8x128xf32> to vector<1x1x8x128xf32>
    tpu.vector_store %arg7[%c0_75, %c20, %c0_76, %c0_77], %104 {strides = array<i32>} : memref<1x32x8x128xf32, #tpu.memory_space<vmem>>, vector<1x1x8x128xf32>,
    %105 = vector.extract_strided_slice %20 {offsets = [40, 128], sizes = [8, 128], strides = [1, 1]} : vector<64x512xf32> to vector<8x128xf32>
    %c0_78 = arith.constant 0 : index
    %c21 = arith.constant 21 : index
    %c0_79 = arith.constant 0 : index
    %c0_80 = arith.constant 0 : index
    %106 = vector.load %arg7[%c0_78, %c21, %c0_79, %c0_80] : memref<1x32x8x128xf32, #tpu.memory_space<vmem>>, vector<1x1x8x128xf32>
    %107 = vector.shape_cast %106 : vector<1x1x8x128xf32> to vector<8x128xf32>
    %108 = vector.shape_cast %105 : vector<8x128xf32> to vector<1x1x8x128xf32>
    tpu.vector_store %arg7[%c0_78, %c21, %c0_79, %c0_80], %108 {strides = array<i32>} : memref<1x32x8x128xf32, #tpu.memory_space<vmem>>, vector<1x1x8x128xf32>,
    %109 = vector.extract_strided_slice %20 {offsets = [40, 256], sizes = [8, 128], strides = [1, 1]} : vector<64x512xf32> to vector<8x128xf32>
    %c0_81 = arith.constant 0 : index
    %c22 = arith.constant 22 : index
    %c0_82 = arith.constant 0 : index
    %c0_83 = arith.constant 0 : index
    %110 = vector.load %arg7[%c0_81, %c22, %c0_82, %c0_83] : memref<1x32x8x128xf32, #tpu.memory_space<vmem>>, vector<1x1x8x128xf32>
    %111 = vector.shape_cast %110 : vector<1x1x8x128xf32> to vector<8x128xf32>
    %112 = vector.shape_cast %109 : vector<8x128xf32> to vector<1x1x8x128xf32>
    tpu.vector_store %arg7[%c0_81, %c22, %c0_82, %c0_83], %112 {strides = array<i32>} : memref<1x32x8x128xf32, #tpu.memory_space<vmem>>, vector<1x1x8x128xf32>,
    %113 = vector.extract_strided_slice %20 {offsets = [40, 384], sizes = [8, 128], strides = [1, 1]} : vector<64x512xf32> to vector<8x128xf32>
    %c0_84 = arith.constant 0 : index
    %c23 = arith.constant 23 : index
    %c0_85 = arith.constant 0 : index
    %c0_86 = arith.constant 0 : index
    %114 = vector.load %arg7[%c0_84, %c23, %c0_85, %c0_86] : memref<1x32x8x128xf32, #tpu.memory_space<vmem>>, vector<1x1x8x128xf32>
    %115 = vector.shape_cast %114 : vector<1x1x8x128xf32> to vector<8x128xf32>
    %116 = vector.shape_cast %113 : vector<8x128xf32> to vector<1x1x8x128xf32>
    tpu.vector_store %arg7[%c0_84, %c23, %c0_85, %c0_86], %116 {strides = array<i32>} : memref<1x32x8x128xf32, #tpu.memory_space<vmem>>, vector<1x1x8x128xf32>,
    %117 = vector.extract_strided_slice %20 {offsets = [48, 0], sizes = [8, 128], strides = [1, 1]} : vector<64x512xf32> to vector<8x128xf32>
    %c0_87 = arith.constant 0 : index
    %c24 = arith.constant 24 : index
    %c0_88 = arith.constant 0 : index
    %c0_89 = arith.constant 0 : index
    %118 = vector.load %arg7[%c0_87, %c24, %c0_88, %c0_89] : memref<1x32x8x128xf32, #tpu.memory_space<vmem>>, vector<1x1x8x128xf32>
    %119 = vector.shape_cast %118 : vector<1x1x8x128xf32> to vector<8x128xf32>
    %120 = vector.shape_cast %117 : vector<8x128xf32> to vector<1x1x8x128xf32>
    tpu.vector_store %arg7[%c0_87, %c24, %c0_88, %c0_89], %120 {strides = array<i32>} : memref<1x32x8x128xf32, #tpu.memory_space<vmem>>, vector<1x1x8x128xf32>,
    %121 = vector.extract_strided_slice %20 {offsets = [48, 128], sizes = [8, 128], strides = [1, 1]} : vector<64x512xf32> to vector<8x128xf32>
    %c0_90 = arith.constant 0 : index
    %c25 = arith.constant 25 : index
    %c0_91 = arith.constant 0 : index
    %c0_92 = arith.constant 0 : index
    %122 = vector.load %arg7[%c0_90, %c25, %c0_91, %c0_92] : memref<1x32x8x128xf32, #tpu.memory_space<vmem>>, vector<1x1x8x128xf32>
    %123 = vector.shape_cast %122 : vector<1x1x8x128xf32> to vector<8x128xf32>
    %124 = vector.shape_cast %121 : vector<8x128xf32> to vector<1x1x8x128xf32>
    tpu.vector_store %arg7[%c0_90, %c25, %c0_91, %c0_92], %124 {strides = array<i32>} : memref<1x32x8x128xf32, #tpu.memory_space<vmem>>, vector<1x1x8x128xf32>,
    %125 = vector.extract_strided_slice %20 {offsets = [48, 256], sizes = [8, 128], strides = [1, 1]} : vector<64x512xf32> to vector<8x128xf32>
    %c0_93 = arith.constant 0 : index
    %c26 = arith.constant 26 : index
    %c0_94 = arith.constant 0 : index
    %c0_95 = arith.constant 0 : index
    %126 = vector.load %arg7[%c0_93, %c26, %c0_94, %c0_95] : memref<1x32x8x128xf32, #tpu.memory_space<vmem>>, vector<1x1x8x128xf32>
    %127 = vector.shape_cast %126 : vector<1x1x8x128xf32> to vector<8x128xf32>
    %128 = vector.shape_cast %125 : vector<8x128xf32> to vector<1x1x8x128xf32>
    tpu.vector_store %arg7[%c0_93, %c26, %c0_94, %c0_95], %128 {strides = array<i32>} : memref<1x32x8x128xf32, #tpu.memory_space<vmem>>, vector<1x1x8x128xf32>,
    %129 = vector.extract_strided_slice %20 {offsets = [48, 384], sizes = [8, 128], strides = [1, 1]} : vector<64x512xf32> to vector<8x128xf32>
    %c0_96 = arith.constant 0 : index
    %c27 = arith.constant 27 : index
    %c0_97 = arith.constant 0 : index
    %c0_98 = arith.constant 0 : index
    %130 = vector.load %arg7[%c0_96, %c27, %c0_97, %c0_98] : memref<1x32x8x128xf32, #tpu.memory_space<vmem>>, vector<1x1x8x128xf32>
    %131 = vector.shape_cast %130 : vector<1x1x8x128xf32> to vector<8x128xf32>
    %132 = vector.shape_cast %129 : vector<8x128xf32> to vector<1x1x8x128xf32>
    tpu.vector_store %arg7[%c0_96, %c27, %c0_97, %c0_98], %132 {strides = array<i32>} : memref<1x32x8x128xf32, #tpu.memory_space<vmem>>, vector<1x1x8x128xf32>,
    %133 = vector.extract_strided_slice %20 {offsets = [56, 0], sizes = [8, 128], strides = [1, 1]} : vector<64x512xf32> to vector<8x128xf32>
    %c0_99 = arith.constant 0 : index
    %c28 = arith.constant 28 : index
    %c0_100 = arith.constant 0 : index
    %c0_101 = arith.constant 0 : index
    %134 = vector.load %arg7[%c0_99, %c28, %c0_100, %c0_101] : memref<1x32x8x128xf32, #tpu.memory_space<vmem>>, vector<1x1x8x128xf32>
    %135 = vector.shape_cast %134 : vector<1x1x8x128xf32> to vector<8x128xf32>
    %136 = vector.shape_cast %133 : vector<8x128xf32> to vector<1x1x8x128xf32>
    tpu.vector_store %arg7[%c0_99, %c28, %c0_100, %c0_101], %136 {strides = array<i32>} : memref<1x32x8x128xf32, #tpu.memory_space<vmem>>, vector<1x1x8x128xf32>,
    %137 = vector.extract_strided_slice %20 {offsets = [56, 128], sizes = [8, 128], strides = [1, 1]} : vector<64x512xf32> to vector<8x128xf32>
    %c0_102 = arith.constant 0 : index
    %c29 = arith.constant 29 : index
    %c0_103 = arith.constant 0 : index
    %c0_104 = arith.constant 0 : index
    %138 = vector.load %arg7[%c0_102, %c29, %c0_103, %c0_104] : memref<1x32x8x128xf32, #tpu.memory_space<vmem>>, vector<1x1x8x128xf32>
    %139 = vector.shape_cast %138 : vector<1x1x8x128xf32> to vector<8x128xf32>
    %140 = vector.shape_cast %137 : vector<8x128xf32> to vector<1x1x8x128xf32>
    tpu.vector_store %arg7[%c0_102, %c29, %c0_103, %c0_104], %140 {strides = array<i32>} : memref<1x32x8x128xf32, #tpu.memory_space<vmem>>, vector<1x1x8x128xf32>,
    %141 = vector.extract_strided_slice %20 {offsets = [56, 256], sizes = [8, 128], strides = [1, 1]} : vector<64x512xf32> to vector<8x128xf32>
    %c0_105 = arith.constant 0 : index
    %c30 = arith.constant 30 : index
    %c0_106 = arith.constant 0 : index
    %c0_107 = arith.constant 0 : index
    %142 = vector.load %arg7[%c0_105, %c30, %c0_106, %c0_107] : memref<1x32x8x128xf32, #tpu.memory_space<vmem>>, vector<1x1x8x128xf32>
    %143 = vector.shape_cast %142 : vector<1x1x8x128xf32> to vector<8x128xf32>
    %144 = vector.shape_cast %141 : vector<8x128xf32> to vector<1x1x8x128xf32>
    tpu.vector_store %arg7[%c0_105, %c30, %c0_106, %c0_107], %144 {strides = array<i32>} : memref<1x32x8x128xf32, #tpu.memory_space<vmem>>, vector<1x1x8x128xf32>,
    %145 = vector.extract_strided_slice %20 {offsets = [56, 384], sizes = [8, 128], strides = [1, 1]} : vector<64x512xf32> to vector<8x128xf32>
    %c0_108 = arith.constant 0 : index
    %c31 = arith.constant 31 : index
    %c0_109 = arith.constant 0 : index
    %c0_110 = arith.constant 0 : index
    %146 = vector.load %arg7[%c0_108, %c31, %c0_109, %c0_110] : memref<1x32x8x128xf32, #tpu.memory_space<vmem>>, vector<1x1x8x128xf32>
    %147 = vector.shape_cast %146 : vector<1x1x8x128xf32> to vector<8x128xf32>
    %148 = vector.shape_cast %145 : vector<8x128xf32> to vector<1x1x8x128xf32>
    tpu.vector_store %arg7[%c0_108, %c31, %c0_109, %c0_110], %148 {strides = array<i32>} : memref<1x32x8x128xf32, #tpu.memory_space<vmem>>, vector<1x1x8x128xf32>,
    return
  }
  func.func @transform_0(%arg0: i32, %arg1: i32) -> (i32, i32, i32) {
    %c0_i32 = arith.constant 0 : i32
    %c0_i32_0 = arith.constant 0 : i32
    return %arg1, %arg0, %c0_i32 : i32, i32, i32
  }
  func.func @transform_1(%arg0: i32, %arg1: i32) -> (i32, i32) {
    %c0_i32 = arith.constant 0 : i32
    %c0_i32_0 = arith.constant 0 : i32
    %c0_i32_1 = arith.constant 0 : i32
    return %c0_i32, %c0_i32_0 : i32, i32
  }
  func.func @transform_2(%arg0: i32, %arg1: i32) -> (i32, i32) {
    %c0_i32 = arith.constant 0 : i32
    %c0_i32_0 = arith.constant 0 : i32
    %c0_i32_1 = arith.constant 0 : i32
    return %c0_i32, %c0_i32_0 : i32, i32
  }
  func.func @transform_3(%arg0: i32, %arg1: i32) -> (i32, i32) {
    %c0_i32 = arith.constant 0 : i32
    %c0_i32_0 = arith.constant 0 : i32
    %c0_i32_1 = arith.constant 0 : i32
    return %c0_i32, %c0_i32_0 : i32, i32
  }
  func.func @transform_4(%arg0: i32, %arg1: i32) -> (i32, i32) {
    %c0_i32 = arith.constant 0 : i32
    %c0_i32_0 = arith.constant 0 : i32
    %c0_i32_1 = arith.constant 0 : i32
    return %c0_i32, %c0_i32_0 : i32, i32
  }
  func.func @transform_5(%arg0: i32, %arg1: i32) -> (i32, i32, i32, i32) {
    %c0_i32 = arith.constant 0 : i32
    %c0_i32_0 = arith.constant 0 : i32
    %c0_i32_1 = arith.constant 0 : i32
    return %arg1, %arg0, %c0_i32, %c0_i32_0 : i32, i32, i32, i32
  }
}

</mosaic_0001>

<bundles_post_ra>
// kernel: tpu_custom_call.1
= control target key start
LH: loop header
LB: loop body
LE: loop exit
PB: predicated region body
PF: predicated region fallthrough
CT: control target
= control target key end

     0   :  { %10 = vsyncpa [#allocation3], 0  ;;  %s2400_s0 = inlined_call_operand.vmem [shape: f32[2,64,32], index: 0, kind: input, shape index: {}]   ;;  %s2401_s1 = inlined_call_operand.vmem [shape: bf16[32,512], index: 1, kind: input, shape index: {}]   ;;  %s2402_s2 = inlined_call_operand.vmem [shape: bf16[512,16], index: 2, kind: input, shape index: {}]   ;;  %s2403_s3 = inlined_call_operand.vmem [shape: bf16[16,512], index: 3, kind: input, shape index: {}]   ;;  %s2404_s4 = inlined_call_operand.vmem [shape: f32[1,512], index: 4, kind: input, shape index: {}]   ;;  %s2405_s5 = inlined_call_operand.hbm [shape: f32[2,32,8,128], index: 5, kind: output, shape index: {}]  }
   0x1   :  { %12 = vsyncpa [#allocation3 + $0x1], 0  ;;  %s1834_s18 = smov 0   ;;  %s1836_s19 = smov 0  }
   0x2   :  { %s1838_s20 = smov 0   ;;  %s1840_s21 = smov 0  }
   0x3   :  { %s1842_s22 = smov 0   ;;  %s1844_s23 = smov 0  }
   0x4 LB: > { %s1351_s24 = sadd.s32 4294967295, %s1800_s23   ;;  %s1352_s25 = sadd.s32 4294967294, %s1800_s23   ;;  %s1800_s23 = sphi %s1844_s23, %s18_s23   ;;  %s1796_s22 = sphi %s1842_s22, %s2412_s22   ;;  %s1792_s21 = sphi %s1840_s21, %s2411_s21   ;;  %s1788_s20 = sphi %s1838_s20, %s2410_s20   ;;  %s1784_s19 = sphi %s1836_s19, %s2409_s19   ;;  %s1780_s18 = sphi %s1834_s18, %s2408_s18  }
   0x5   : > { %s27_s26 = sadd.s32 1, %s1796_s22  ;;  %s151_s27 = sadd.s32 1, %s1788_s20 }
   0x6   : > { %p28_p0 = scmp.ge.s32.totalorder %s27_s26, 2  ;;  %p161_p1 = scmp.ne.s32.totalorder %s1788_s20, %s1784_s19 }
   0x7   : > { %p162_p2 = scmp.eq.s32.totalorder %s1351_s24, 1  ;;  %p167_p3 = scmp.ne.s32.totalorder %s1784_s19, %s1780_s18 }
   0x8   : > { %s2414_s26 = smov (%p28_p0, %s27_s26), 0  ;;  %p168_p5 = scmp.eq.s32.totalorder %s1352_s25, 1 }
   0x9   : > { %p1874_p4 = por %p162_p2, %p161_p1  ;;  %s146_s29 = ssub.s32 %s1796_s22, %s2414_s26 }
   0xa   : > { %p1355_p6 = scmp.ge.s32.totalorder %s1800_s23, 1  ;;  %p149_p7 = scmp.eq.s32.totalorder %s146_s29, 0 }
   0xb   : > { %p1881_p8 = por %p168_p5, %p167_p3  ;;  %p211_p9 = scmp.lt.s32.totalorder %s1800_s23, 3 }
   0xc   : > { %s1887_s6 = scalar_select %p149_p7, %s1788_s20, %s151_s27  }
   0xd   : > { %p212_p10 = pnand %p1355_p6, %p211_p9 }
   0xe   : > { %p244_p11 = scmp.lt.s32.totalorder (!%p212_p10), %s1792_s21, 1  ;;  %s240_s7 = sand.u32 (!%p212_p10), 1, %s1784_s19  }
   0xf   : > { %215 = sbr.rel (%p212_p10) target bundleno = 543 (0x21f), region = 40  ;;  %s1648_s11 = sshll.u32 (!%p212_p10), %s1792_s21, 8 }
  0x10   : > { %s1268_s15 = scalar_lea.hbm (!%p212_p10), %s2405_s5, %s1648_s11  ;;  %s1255_s17 = scalar_lea.sflag (!%p212_p10), [#allocation3], %s240_s7 }
  0x11   : > { %s1271_s16 = sshll.u32 (!%p212_p10), %s1268_s15, 4  ;;  %s1742_s8 = scalar_lea.hbm (!%p212_p10), %s2405_s5, 512  ;;  %s1272_s16 = int_to_ptr.hbm [resolvable:$true] %s1271_s16 }
  0x12   : > { %s1736_s24 = sshra.s32 (!%p212_p10), %s1272_s16, 4  ;;  %s1737_s24 = int_to_ptr.hbm [resolvable:$true] %s1736_s24 }
  0x13   : > { %s1738_s25 = scalar_lea.hbm (!%p212_p10), %s1737_s24, 256  ;;  %p1743_p1 = scmp.lt.s32.totalorder (!%p212_p10), %s1737_s24, %s2405_s5 }
  0x14   : > { %v1377_v0 = vld [vmem:[%s2401_s1 + $0x20] sm:$0xf]  ;;  %v1610_v1 = vld [vmem:[%s2401_s1 + $0x2c] sm:$0xf0]  ;;  %v1608_v2 = vld [vmem:[%s2401_s1 + $0x24] sm:$0xf]  ;;  %p1739_p12 = scmp.ne.s32.totalorder %s1737_s24, %s1738_s25  ;;  %p1744_p2 = scmp.lt.s32.totalorder %s1742_s8, %s1738_s25 }
  0x15   : > { %v1378_v3 = vor.u32 %v1610_v1, %v1377_v0  ;;  %v1379_v4 = vld [vmem:[%s2401_s1 + $0x30] sm:$0xf0]  ;;  %v1385_v5 = vld [vmem:[%s2401_s1 + $0x28] sm:$0xf]  ;;  %v1611_v6 = vld [vmem:[%s2401_s1 + $0x34] sm:$0xf0] }
  0x16   : > { %v1382_v7 = vor.u32 %v1608_v2, %v1379_v4  ;;  %v1386_v8 = vor.u32 %v1611_v6, %v1385_v5  ;;  %v1609_v9 = vld [vmem:[%s2401_s1 + $0x2c] sm:$0xf]  ;;  %v1387_v10 = vld [vmem:[%s2401_s1 + $0x38] sm:$0xf0]  ;;  %v1361_v11 = vld [vmem:[%s2401_s1] sm:$0xf]  ;;  %p1740_p13 = pnand %p1739_p12, %p1874_p4  ;;  %p1745_p3 = por %p1744_p2, %p1743_p1 }
  0x17   : > { %334 = vmatpush.bf16.msra.mxu0 %v1378_v3  ;;  %v1390_v12 = vor.u32 %v1609_v9, %v1387_v10  ;;  %v1606_v13 = vld [vmem:[%s2401_s1 + $0xc] sm:$0xf0]  ;;  %v1604_v14 = vld [vmem:[%s2401_s1 + $0x4] sm:$0xf]  ;;  %v1363_v15 = vld [vmem:[%s2401_s1 + $0x10] sm:$0xf0] }
  0x18   : > { %363 = vmatpush.bf16.msra.mxu1 %v1382_v7  ;;  %392 = vmatpush.bf16.msra.mxu2 %v1386_v8  ;;  %v1362_v16 = vor.u32 %v1606_v13, %v1361_v11  ;;  %v1366_v17 = vor.u32 %v1604_v14, %v1363_v15  ;;  %v1369_v18 = vld [vmem:[%s2401_s1 + $0x8] sm:$0xf]  ;;  %v1607_v19 = vld [vmem:[%s2401_s1 + $0x14] sm:$0xf0]  ;;  %v1605_v20 = vld [vmem:[%s2401_s1 + $0xc] sm:$0xf]  ;;  %p1741_p0 = pneg %p1740_p13 }
  0x19   : > { %421 = vmatpush.bf16.msra.mxu3 %v1390_v12  ;;  %v1370_v21 = vor.u32 %v1607_v19, %v1369_v18  ;;  %v1371_v22 = vld [vmem:[%s2401_s1 + $0x18] sm:$0xf0]  ;;  %s245_s9 = scalar_select %p244_p11, %s1792_s21, 1  ;;  %vm315_vm0 = vcmask 261120   ;;  %v1634_v34 = vld [vmem:[%s2402_s2 + $0xb0] sm:$0xff]  ;;  %v1633_v38 = vld [vmem:[%s2402_s2 + $0xa8] sm:$0xff] }
  0x1a   : > { %v1374_v23 = vor.u32 %v1605_v20, %v1371_v22  ;;  %v1635_v30 = vld [vmem:[%s2402_s2 + $0xb8] sm:$0xff]  ;;  %v1642_v35 = vld [vmem:[%s2402_s2 + $0xf0] sm:$0xff]  ;;  %v1641_v39 = vld [vmem:[%s2402_s2 + $0xe8] sm:$0xff]  ;;  %vm988_vm7 = vcmask 130048   ;;  %p1746_p5 = pnand %p1745_p3, %p1741_p0 }
  0x1b   : > { %335 = vmatpush.bf16.msra.mxu0 %v1362_v16  ;;  %s1603_s10 = sshll.u32 %s245_s9, 6  ;;  %v1643_v31 = vld [vmem:[%s2402_s2 + $0xf8] sm:$0xff]  ;;  %v1618_v36 = vld [vmem:[%s2402_s2 + $0x30] sm:$0xff]  ;;  %v1617_v40 = vld [vmem:[%s2402_s2 + $0x28] sm:$0xff]  ;;  %s1356_s9 = sshll.u32 %s240_s7, 8 }
  0x1c   : > { %364 = vmatpush.bf16.msra.mxu1 %v1366_v17  ;;  %393 = vmatpush.bf16.msra.mxu2 %v1370_v21  ;;  %s1942_s13 = scalar_lea.vmem %s2400_s0, %s1603_s10  ;;  %v1619_v32 = vld [vmem:[%s2402_s2 + $0x38] sm:$0xff]  ;;  %v1626_v37 = vld [vmem:[%s2402_s2 + $0x70] sm:$0xff]  ;;  %v1625_v41 = vld [vmem:[%s2402_s2 + $0x68] sm:$0xff]  ;;  %s2263_s10 = scalar_lea.vmem [#allocation2], %s1356_s9 }
  0x1d   : > { %422 = vmatpush.bf16.msra.mxu3 %v1374_v23  ;;  %v255_v24 = vld [vmem:[%s1942_s13] sm:$0xff]  ;;  %v256_v25 = vld [vmem:[%s1942_s13 + $0x8] sm:$0xff]  ;;  %v257_v27 = vld [vmem:[%s1942_s13 + $0x10] sm:$0xff]  ;;  %s1269_s21 = sshll.u32 %s2263_s10, 4  ;;  %s1270_s21 = int_to_ptr.vmem [resolvable:$true] %s1269_s21 }
  0x1e   : > { %v263_v26 = vpack.c.bf16 %v256_v25, %v255_v24  ;;  %v258_v28 = vld [vmem:[%s1942_s13 + $0x18] sm:$0xff]  ;;  %v259_v42 = vld [vmem:[%s1942_s13 + $0x20] sm:$0xff]  ;;  %v260_v43 = vld [vmem:[%s1942_s13 + $0x28] sm:$0xff] }
  0x1f   : > { %v264_v29 = vpack.c.bf16 %v258_v28, %v257_v27  ;;  %v1627_v33 = vld [vmem:[%s2402_s2 + $0x78] sm:$0xff]  ;;  %748 = vmatpush.bf16.msrb.mxu0 %v1619_v32  ;;  %v1632_v44 = vld [vmem:[%s2402_s2 + $0xa0] sm:$0xff]  ;;  %v265_v46 = vpack.c.bf16 %v260_v43, %v259_v42  ;;  %v1630_v53 = vld [vmem:[%s2402_s2 + $0x90] sm:$0xff] }
  0x20   : > { %1391 = vmatmul.msk.bf16.vlgmr.msra.gmra.mxu0 %vm315_vm0, %v263_v26  ;;  %1395 = vmatmul.msk.bf16.vlgmr.msra.gmra.mxu1 %vm315_vm0, %v263_v26  ;;  %v1640_v45 = vld [vmem:[%s2402_s2 + $0xe0] sm:$0xff]  ;;  %v1631_v49 = vld [vmem:[%s2402_s2 + $0x98] sm:$0xff]  ;;  %v1638_v54 = vld [vmem:[%s2402_s2 + $0xd0] sm:$0xff] }
  0x21   : > { %1399 = vmatmul.msk.bf16.vlgmr.msra.gmra.mxu2 %vm315_vm0, %v263_v26  ;;  %1403 = vmatmul.msk.bf16.vlgmr.msra.gmra.mxu3 %vm315_vm0, %v263_v26  ;;  %v1616_v47 = vld [vmem:[%s2402_s2 + $0x20] sm:$0xff]  ;;  %v1639_v50 = vld [vmem:[%s2402_s2 + $0xd8] sm:$0xff]  ;;  %v1614_v55 = vld [vmem:[%s2402_s2 + $0x10] sm:$0xff] }
  0x22   : > { %806 = vmatpush.bf16.msrb.mxu2 %v1635_v30  ;;  %835 = vmatpush.bf16.msrb.mxu3 %v1643_v31  ;;  %v1624_v48 = vld [vmem:[%s2402_s2 + $0x60] sm:$0xff]  ;;  %v1615_v51 = vld [vmem:[%s2402_s2 + $0x18] sm:$0xff]  ;;  %v1622_v56 = vld [vmem:[%s2402_s2 + $0x50] sm:$0xff] }
  0x23   : > { %777 = vmatpush.bf16.msrb.mxu1 %v1627_v33  ;;  %749 = vmatpush.bf16.msrb.mxu0 %v1618_v36  ;;  %v1623_v52 = vld [vmem:[%s2402_s2 + $0x58] sm:$0xff]  ;;  %v261_v57 = vld [vmem:[%s1942_s13 + $0x30] sm:$0xff]  ;;  %v1629_v60 = vld [vmem:[%s2402_s2 + $0x88] sm:$0xff] }
  0x24   : > { %v262_v58 = vld [vmem:[%s1942_s13 + $0x38] sm:$0xff]  ;;  %v1637_v61 = vld [vmem:[%s2402_s2 + $0xc8] sm:$0xff]  ;;  %v1612_v0 = vld [vmem:[%s2402_s2] sm:$0xff] }
  0x25   : > { %v266_v59 = vpack.c.bf16 %v262_v58, %v261_v57  ;;  %v1613_v62 = vld [vmem:[%s2402_s2 + $0x8] sm:$0xff]  ;;  %v1620_v1 = vld [vmem:[%s2402_s2 + $0x40] sm:$0xff] }
  0x26   : > { %807 = vmatpush.bf16.msrb.mxu2 %v1634_v34  ;;  %836 = vmatpush.bf16.msrb.mxu3 %v1642_v35  ;;  %v1621_v63 = vld [vmem:[%s2402_s2 + $0x48] sm:$0xff]  ;;  %v1628_v2 = vld [vmem:[%s2402_s2 + $0x80] sm:$0xff] }
  0x27   : > { %778 = vmatpush.bf16.msrb.mxu1 %v1626_v37  ;;  %750 = vmatpush.bf16.msrb.mxu0 %v1617_v40  ;;  %v1636_v3 = vld [vmem:[%s2402_s2 + $0xc0] sm:$0xff] }
  0x2a   : > { %808 = vmatpush.bf16.msrb.mxu2 %v1633_v38  ;;  %837 = vmatpush.bf16.msrb.mxu3 %v1641_v39 }
  0x2b   : > { %779 = vmatpush.bf16.msrb.mxu1 %v1625_v41  ;;  %751 = vmatpush.bf16.msrb.mxu0 %v1616_v47  ;;  %v1647_v47 = vld [vmem:[%s2403_s3 + $0x14] sm:$0xf0] }
  0x2e   : > { %809 = vmatpush.bf16.msrb.mxu2 %v1632_v44  ;;  %838 = vmatpush.bf16.msrb.mxu3 %v1640_v45 }
  0x2f   : > { %780 = vmatpush.bf16.msrb.mxu1 %v1624_v48  ;;  %752 = vmatpush.bf16.msrb.mxu0 %v1615_v51  ;;  %v1645_v48 = vld [vmem:[%s2403_s3 + $0xc] sm:$0xf]  ;;  %v1537_v51 = vld [vmem:[%s2403_s3] sm:$0xf] }
  0x30   : > { %1392 = vmatmul.msk.bf16.gmra.mxu0 %vm315_vm0, %v264_v29  ;;  %1396 = vmatmul.msk.bf16.gmra.mxu1 %vm315_vm0, %v264_v29 }
  0x31   : > { %1400 = vmatmul.msk.bf16.gmra.mxu2 %vm315_vm0, %v264_v29  ;;  %1404 = vmatmul.msk.bf16.gmra.mxu3 %vm315_vm0, %v264_v29 }
  0x32   : > { %810 = vmatpush.bf16.msrb.mxu2 %v1631_v49  ;;  %839 = vmatpush.bf16.msrb.mxu3 %v1639_v50  ;;  %v1547_v50 = vld [vmem:[%s2403_s3 + $0x18] sm:$0xf0] }
  0x33   : > { %781 = vmatpush.bf16.msrb.mxu1 %v1623_v52  ;;  %753 = vmatpush.bf16.msrb.mxu0 %v1614_v55  ;;  %v1646_v52 = vld [vmem:[%s2403_s3 + $0xc] sm:$0xf0]  ;;  %v1644_v55 = vld [vmem:[%s2403_s3 + $0x4] sm:$0xf] }
  0x36   : > { %811 = vmatpush.bf16.msrb.mxu2 %v1630_v53  ;;  %840 = vmatpush.bf16.msrb.mxu3 %v1638_v54  ;;  %v1550_v53 = vor.u32 %v1645_v48, %v1547_v50  ;;  %v1538_v54 = vor.u32 %v1646_v52, %v1537_v51 }
  0x37   : > { %782 = vmatpush.bf16.msrb.mxu1 %v1622_v56  ;;  %754 = vmatpush.bf16.msrb.mxu0 %v1613_v62  ;;  %v1539_v56 = vld [vmem:[%s2403_s3 + $0x10] sm:$0xf0] }
  0x3a   : > { %812 = vmatpush.bf16.msrb.mxu2 %v1629_v60  ;;  %841 = vmatpush.bf16.msrb.mxu3 %v1637_v61  ;;  %v1542_v61 = vor.u32 %v1644_v55, %v1539_v56 }
  0x3b   : > { %783 = vmatpush.bf16.msrb.mxu1 %v1621_v63  ;;  %755 = vmatpush.bf16.msrb.mxu0 %v1612_v0 }
  0x3e   : > { %813 = vmatpush.bf16.msrb.mxu2 %v1628_v2  ;;  %842 = vmatpush.bf16.msrb.mxu3 %v1636_v3 }
  0x3f   : > { %784 = vmatpush.bf16.msrb.mxu1 %v1620_v1  ;;  %1008 = vmatpush.bf16.msra.mxu0 %v1538_v54 }
  0x40   : > { %1393 = vmatmul.msk.bf16.gmra.mxu0 %vm315_vm0, %v265_v46  ;;  %1397 = vmatmul.msk.bf16.gmra.mxu1 %vm315_vm0, %v265_v46 }
  0x41   : > { %1401 = vmatmul.msk.bf16.gmra.mxu2 %vm315_vm0, %v265_v46  ;;  %1405 = vmatmul.msk.bf16.gmra.mxu3 %vm315_vm0, %v265_v46  ;;  %v1545_v46 = vld [vmem:[%s2403_s3 + $0x8] sm:$0xf] }
  0x42   : > { %v1546_v49 = vor.u32 %v1647_v47, %v1545_v46  ;;  %1095 = vmatpush.bf16.msra.mxu3 %v1550_v53 }
  0x43   : > { %1037 = vmatpush.bf16.msra.mxu1 %v1542_v61 }
  0x44   : > { %1066 = vmatpush.bf16.msra.mxu2 %v1546_v49 }
  0x50   : > { %1394 = vmatmul.msk.bf16.gmra.mxu0 %vm315_vm0, %v266_v59  ;;  %1398 = vmatmul.msk.bf16.gmra.mxu1 %vm315_vm0, %v266_v59 }
  0x51   : > { %1402 = vmatmul.msk.bf16.gmra.mxu2 %vm315_vm0, %v266_v59  ;;  %1406 = vmatmul.msk.bf16.gmra.mxu3 %vm315_vm0, %v266_v59 }
  0x9d   : > { %v2064_v4 = vpop.f32.mrf.mxu0  ;;  %v2066_v5 = vpop.f32.mrf.mxu1 }
  0x9e   : > { %v444_v6 = vmul.f32 %v2064_v4, %v2064_v4  ;;  %v445_v7 = vmul.f32 %v2066_v5, %v2066_v5 }
  0xa4   : > { %v2072_v8 = vpop.f32.mrf.mxu2  ;;  %v2074_v9 = vpop.f32.mrf.mxu3 }
  0xa5   : > { %v2076_v10 = vpop.f32.mrf.mxu0  ;;  %v2078_v11 = vpop.f32.mrf.mxu1  ;;  %v446_v18 = vmul.f32 %v2072_v8, %v2072_v8  ;;  %v447_v19 = vmul.f32 %v2074_v9, %v2074_v9 }
  0xa6   : > { %v448_v12 = vmul.f32 %v2076_v10, %v2076_v10  ;;  %v449_v13 = vmul.f32 %v2078_v11, %v2078_v11 }
  0xa8   : > { %v476_v14 = vpack.c.bf16 %v448_v12, %v444_v6  ;;  %v477_v15 = vpack.c.bf16 %v449_v13, %v445_v7 }
  0xaa   : > { %756 = vmatmul.bf16.vlgmr.msrb.gmra.mxu0 %v476_v14  ;;  %785 = vmatmul.bf16.vlgmr.msrb.gmra.mxu1 %v477_v15 }
  0xac   : > { %v2084_v16 = vpop.f32.mrf.mxu2  ;;  %v2086_v17 = vpop.f32.mrf.mxu3 }
  0xad   : > { %v450_v20 = vmul.f32 %v2084_v16, %v2084_v16  ;;  %v451_v21 = vmul.f32 %v2086_v17, %v2086_v17  ;;  %v2096_v22 = vpop.f32.mrf.mxu0  ;;  %v2098_v23 = vpop.f32.mrf.mxu1 }
  0xae   : > { %v452_v26 = vmul.f32 %v2096_v22, %v2096_v22  ;;  %v453_v27 = vmul.f32 %v2098_v23, %v2098_v23 }
  0xaf   : > { %v478_v24 = vpack.c.bf16 %v450_v20, %v446_v18  ;;  %v479_v25 = vpack.c.bf16 %v451_v21, %v447_v19 }
  0xb1   : > { %814 = vmatmul.bf16.vlgmr.msrb.gmra.mxu2 %v478_v24  ;;  %843 = vmatmul.bf16.vlgmr.msrb.gmra.mxu3 %v479_v25 }
  0xb4   : > { %v2104_v28 = vpop.f32.mrf.mxu2  ;;  %v2106_v29 = vpop.f32.mrf.mxu3 }
  0xb5   : > { %v2108_v30 = vpop.f32.mrf.mxu0  ;;  %v2110_v31 = vpop.f32.mrf.mxu1  ;;  %v454_v38 = vmul.f32 %v2104_v28, %v2104_v28  ;;  %v455_v39 = vmul.f32 %v2106_v29, %v2106_v29 }
  0xb6   : > { %v456_v32 = vmul.f32 %v2108_v30, %v2108_v30  ;;  %v457_v33 = vmul.f32 %v2110_v31, %v2110_v31 }
  0xb8   : > { %v480_v34 = vpack.c.bf16 %v456_v32, %v452_v26  ;;  %v481_v35 = vpack.c.bf16 %v457_v33, %v453_v27 }
  0xba   : > { %761 = vmatmul.bf16.gmra.mxu0 %v480_v34  ;;  %790 = vmatmul.bf16.gmra.mxu1 %v481_v35 }
  0xbc   : > { %v2116_v36 = vpop.f32.mrf.mxu2  ;;  %v2118_v37 = vpop.f32.mrf.mxu3 }
  0xbd   : > { %v458_v40 = vmul.f32 %v2116_v36, %v2116_v36  ;;  %v459_v41 = vmul.f32 %v2118_v37, %v2118_v37  ;;  %v2128_v42 = vpop.f32.mrf.mxu0  ;;  %v2130_v43 = vpop.f32.mrf.mxu1 }
  0xbe   : > { %v460_v57 = vmul.f32 %v2128_v42, %v2128_v42  ;;  %v461_v58 = vmul.f32 %v2130_v43, %v2130_v43 }
  0xbf   : > { %v482_v44 = vpack.c.bf16 %v458_v40, %v454_v38  ;;  %v483_v45 = vpack.c.bf16 %v459_v41, %v455_v39 }
  0xc1   : > { %819 = vmatmul.bf16.gmra.mxu2 %v482_v44  ;;  %848 = vmatmul.bf16.gmra.mxu3 %v483_v45 }
  0xc4   : > { %v2160_v59 = vpop.f32.mrf.mxu2  ;;  %v2162_v60 = vpop.f32.mrf.mxu3 }
  0xc5   : > { %v2164_v62 = vpop.f32.mrf.mxu0  ;;  %v2166_v63 = vpop.f32.mrf.mxu1  ;;  %v462_v12 = vmul.f32 %v2160_v59, %v2160_v59  ;;  %v463_v13 = vmul.f32 %v2162_v60, %v2162_v60 }
  0xc6   : > { %v464_v0 = vmul.f32 %v2164_v62, %v2164_v62  ;;  %v465_v1 = vmul.f32 %v2166_v63, %v2166_v63 }
  0xc8   : > { %v484_v2 = vpack.c.bf16 %v464_v0, %v460_v57  ;;  %v485_v3 = vpack.c.bf16 %v465_v1, %v461_v58 }
  0xca   : > { %766 = vmatmul.bf16.gmra.mxu0 %v484_v2  ;;  %795 = vmatmul.bf16.gmra.mxu1 %v485_v3 }
  0xcc   : > { %v2172_v6 = vpop.f32.mrf.mxu2  ;;  %v2174_v7 = vpop.f32.mrf.mxu3 }
  0xcd   : > { %v466_v14 = vmul.f32 %v2172_v6, %v2172_v6  ;;  %v467_v15 = vmul.f32 %v2174_v7, %v2174_v7  ;;  %v2184_v18 = vpop.f32.mrf.mxu0  ;;  %v2186_v19 = vpop.f32.mrf.mxu1 }
  0xce   : > { %v468_v24 = vmul.f32 %v2184_v18, %v2184_v18  ;;  %v469_v25 = vmul.f32 %v2186_v19, %v2186_v19 }
  0xcf   : > { %v486_v20 = vpack.c.bf16 %v466_v14, %v462_v12  ;;  %v487_v21 = vpack.c.bf16 %v467_v15, %v463_v13 }
  0xd1   : > { %824 = vmatmul.bf16.gmra.mxu2 %v486_v20  ;;  %853 = vmatmul.bf16.gmra.mxu3 %v487_v21 }
  0xd4   : > { %v2192_v26 = vpop.f32.mrf.mxu2  ;;  %v2194_v27 = vpop.f32.mrf.mxu3 }
  0xd5   : > { %v2196_v32 = vpop.f32.mrf.mxu0  ;;  %v2198_v33 = vpop.f32.mrf.mxu1  ;;  %v470_v44 = vmul.f32 %v2192_v26, %v2192_v26  ;;  %v471_v45 = vmul.f32 %v2194_v27, %v2194_v27 }
  0xd6   : > { %v472_v34 = vmul.f32 %v2196_v32, %v2196_v32  ;;  %v473_v35 = vmul.f32 %v2198_v33, %v2198_v33 }
  0xd8   : > { %v488_v38 = vpack.c.bf16 %v472_v34, %v468_v24  ;;  %v489_v39 = vpack.c.bf16 %v473_v35, %v469_v25 }
  0xda   : > { %771 = vmatmul.bf16.gmra.mxu0 %v488_v38  ;;  %800 = vmatmul.bf16.gmra.mxu1 %v489_v39 }
  0xdc   : > { %v2204_v40 = vpop.f32.mrf.mxu2  ;;  %v2206_v41 = vpop.f32.mrf.mxu3 }
  0xdd   : > { %v474_v46 = vmul.f32 %v2204_v40, %v2204_v40  ;;  %v475_v47 = vmul.f32 %v2206_v41, %v2206_v41 }
  0xdf   : > { %v490_v48 = vpack.c.bf16 %v474_v46, %v470_v44  ;;  %v491_v49 = vpack.c.bf16 %v475_v47, %v471_v45 }
  0xe1   : > { %829 = vmatmul.bf16.gmra.mxu2 %v490_v48  ;;  %858 = vmatmul.bf16.gmra.mxu3 %v491_v49 }
 0x127   : > { %v757_v50 = vpop.f32.mrf.mxu0  ;;  %v786_v51 = vpop.f32.mrf.mxu1 }
 0x128   : > { %v787_v54 = vadd.f32 %v786_v51, %v757_v50 }
 0x12f   : > { %v759_v52 = vpop.f32.mrf.mxu0  ;;  %v788_v53 = vpop.f32.mrf.mxu1 }
 0x130   : > { %v789_v2 = vadd.f32 %v788_v53, %v759_v52 }
 0x134   : > { %v815_v55 = vpop.f32.mrf.mxu2  ;;  %v844_v56 = vpop.f32.mrf.mxu3 }
 0x135   : > { %v816_v57 = vadd.f32 %v815_v55, %v787_v54 }
 0x137   : > { %v845_v58 = vadd.f32 %v844_v56, %v816_v57  ;;  %v762_v61 = vpop.f32.mrf.mxu0  ;;  %v791_v0 = vpop.f32.mrf.mxu1 }
 0x138   : > { %v792_v34 = vadd.f32 %v791_v0, %v762_v61 }
 0x139   : > { %v864_v1 = vmul.f32 0.03125, %v845_v58 }
 0x13b   : > { %v872_v3 = vadd.f32 1e-05, %v864_v1 }
 0x13c   : > { %v817_v12 = vpop.f32.mrf.mxu2  ;;  %v846_v13 = vpop.f32.mrf.mxu3 }
 0x13d   : > { %1706 = vrsqrt.f32 %v872_v3  ;;  %v818_v14 = vadd.f32 %v817_v12, %v789_v2  ;;  %vm886_vm3 = vweird.f32 %v872_v3 }
 0x13f   : > { %v847_v15 = vadd.f32 %v846_v13, %v818_v14  ;;  %v764_v20 = vpop.f32.mrf.mxu0  ;;  %v793_v21 = vpop.f32.mrf.mxu1 }
 0x140   : > { %v794_v53 = vadd.f32 %v793_v21, %v764_v20 }
 0x141   : > { %v865_v24 = vmul.f32 0.03125, %v847_v15 }
 0x143   : > { %v1707_v25 = vpop.eup %1706  ;;  %v873_v35 = vadd.f32 1e-05, %v865_v24 }
 0x144   : > { %v881_v38 = vmul.f32 %v1707_v25, %v872_v3  ;;  %v820_v39 = vpop.f32.mrf.mxu2  ;;  %v849_v44 = vpop.f32.mrf.mxu3  ;;  %vm887_vm1 = vweird.f32 %v1707_v25 }
 0x145   : > { %1708 = vrsqrt.f32 %v873_v35  ;;  %v821_v45 = vadd.f32 %v820_v39, %v792_v34  ;;  %vm888_vm4 = vmor %vm886_vm3, %vm887_vm1  ;;  %vm896_vm5 = vweird.f32 %v873_v35 }
 0x146   : > { %v882_v46 = vmul.f32 %v1707_v25, %v881_v38 }
 0x147   : > { %v850_v47 = vadd.f32 %v849_v44, %v821_v45  ;;  %v767_v49 = vpop.f32.mrf.mxu0  ;;  %v796_v50 = vpop.f32.mrf.mxu1 }
 0x148   : > { %v883_v51 = vmul.f32 0.5, %v882_v46  ;;  %v797_v20 = vadd.f32 %v796_v50, %v767_v49 }
 0x149   : > { %v866_v48 = vmul.f32 0.03125, %v850_v47 }
 0x14a   : > { %v884_v61 = vsub.f32 1.5, %v883_v51 }
 0x14b   : > { %v1709_v52 = vpop.eup %1708  ;;  %v2216_v54 = vadd.f32 1e-05, %v866_v48 }
 0x14c   : > { %v891_v55 = vmul.f32 %v1709_v52, %v873_v35  ;;  %v822_v56 = vpop.f32.mrf.mxu2  ;;  %v851_v57 = vpop.f32.mrf.mxu3  ;;  %v885_v13 = vmul.f32 %v1707_v25, %v884_v61  ;;  %vm897_vm2 = vweird.f32 %v1709_v52 }
 0x14d   : > { %1710 = vrsqrt.f32 %v2216_v54  ;;  %v823_v58 = vadd.f32 %v822_v56, %v794_v53  ;;  %vm898_vm6 = vmor %vm896_vm5, %vm897_vm2  ;;  %vm906_vm10 = vweird.f32 %v2216_v54 }
 0x14e   : > { %v892_v0 = vmul.f32 %v1709_v52, %v891_v55  ;;  %v889_v47 = vsel %vm888_vm4, %v1707_v25, %v885_v13 }
 0x14f   : > { %v852_v1 = vadd.f32 %v851_v57, %v823_v58  ;;  %v769_v24 = vpop.f32.mrf.mxu0  ;;  %v798_v34 = vpop.f32.mrf.mxu1 }
 0x150   : > { %v893_v2 = vmul.f32 0.5, %v892_v0  ;;  %v799_v55 = vadd.f32 %v798_v34, %v769_v24 }
 0x151   : > { %v867_v12 = vmul.f32 0.03125, %v852_v1 }
 0x152   : > { %v894_v14 = vsub.f32 1.5, %v893_v2 }
 0x153   : > { %v2219_v15 = vpop.eup %1710  ;;  %v875_v21 = vadd.f32 1e-05, %v867_v12 }
 0x154   : > { %v895_v38 = vmul.f32 %v1709_v52, %v894_v14  ;;  %v901_v39 = vmul.f32 %v2219_v15, %v2216_v54  ;;  %v825_v44 = vpop.f32.mrf.mxu2  ;;  %v854_v45 = vpop.f32.mrf.mxu3  ;;  %vm907_vm8 = vweird.f32 %v2219_v15 }
 0x155   : > { %1712 = vrsqrt.f32 %v875_v21  ;;  %v826_v46 = vadd.f32 %v825_v44, %v797_v20  ;;  %vm908_vm11 = vmor %vm906_vm10, %vm907_vm8  ;;  %vm916_vm12 = vweird.f32 %v875_v21 }
 0x156   : > { %v899_v48 = vsel %vm898_vm6, %v1709_v52, %v895_v38  ;;  %v902_v51 = vmul.f32 %v2219_v15, %v901_v39 }
 0x157   : > { %v960_v3 = vpack.c.bf16 %v899_v48, %v889_v47  ;;  %v855_v49 = vadd.f32 %v854_v45, %v826_v46  ;;  %v772_v1 = vpop.f32.mrf.mxu0  ;;  %v801_v2 = vpop.f32.mrf.mxu1 }
 0x158   : > { %v903_v35 = vmul.f32 0.5, %v902_v51  ;;  %v802_v38 = vadd.f32 %v801_v2, %v772_v1 }
 0x159   : > { %v868_v50 = vmul.f32 0.03125, %v855_v49  ;;  %1551 = vmatmul.msk.bf16.vlgmr.msra.gmra.mxu0 %vm988_vm7, %v960_v3  ;;  %1555 = vmatmul.msk.bf16.vlgmr.msra.gmra.mxu1 %vm988_vm7, %v960_v3 }
 0x15a   : > { %1559 = vmatmul.msk.bf16.vlgmr.msra.gmra.mxu2 %vm988_vm7, %v960_v3  ;;  %1563 = vmatmul.msk.bf16.vlgmr.msra.gmra.mxu3 %vm988_vm7, %v960_v3  ;;  %v904_v61 = vsub.f32 1.5, %v903_v35 }
 0x15b   : > { %v1713_v53 = vpop.eup %1712  ;;  %v2228_v56 = vadd.f32 1e-05, %v868_v50 }
 0x15c   : > { %v911_v25 = vmul.f32 %v1713_v53, %v875_v21  ;;  %v827_v52 = vpop.f32.mrf.mxu2  ;;  %v856_v57 = vpop.f32.mrf.mxu3  ;;  %v905_v20 = vmul.f32 %v2219_v15, %v904_v61  ;;  %vm917_vm9 = vweird.f32 %v1713_v53 }
 0x15d   : > { %1714 = vrsqrt.f32 %v2228_v56  ;;  %v828_v58 = vadd.f32 %v827_v52, %v799_v55  ;;  %vm918_vm13 = vmor %vm916_vm12, %vm917_vm9  ;;  %vm926_vm0 = vweird.f32 %v2228_v56 }
 0x15e   : > { %v912_v0 = vmul.f32 %v1713_v53, %v911_v25  ;;  %v909_v3 = vsel %vm908_vm11, %v2219_v15, %v905_v20 }
 0x15f   : > { %v857_v12 = vadd.f32 %v856_v57, %v828_v58  ;;  %v774_v55 = vpop.f32.mrf.mxu0  ;;  %v803_v54 = vpop.f32.mrf.mxu1 }
 0x160   : > { %v913_v13 = vmul.f32 0.5, %v912_v0  ;;  %v804_v57 = vadd.f32 %v803_v54, %v774_v55 }
 0x161   : > { %v869_v14 = vmul.f32 0.03125, %v857_v12 }
 0x162   : > { %v914_v24 = vsub.f32 1.5, %v913_v13 }
 0x163   : > { %v1715_v34 = vpop.eup %1714  ;;  %v877_v39 = vadd.f32 1e-05, %v869_v14 }
 0x164   : > { %v915_v44 = vmul.f32 %v1713_v53, %v914_v24  ;;  %v921_v45 = vmul.f32 %v1715_v34, %v2228_v56  ;;  %v830_v46 = vpop.f32.mrf.mxu2  ;;  %v859_v47 = vpop.f32.mrf.mxu3  ;;  %vm927_vm14 = vweird.f32 %v1715_v34 }
 0x165   : > { %1716 = vrsqrt.f32 %v877_v39  ;;  %v831_v48 = vadd.f32 %v830_v46, %v802_v38  ;;  %vm928_vm1 = vmor %vm926_vm0, %vm927_vm14  ;;  %vm936_vm2 = vweird.f32 %v877_v39 }
 0x166   : > { %v922_v51 = vmul.f32 %v1715_v34, %v921_v45  ;;  %v919_v49 = vsel %vm918_vm13, %v1713_v53, %v915_v44 }
 0x167   : > { %v860_v50 = vadd.f32 %v859_v47, %v831_v48  ;;  %v961_v35 = vpack.c.bf16 %v919_v49, %v909_v3 }
 0x168   : > { %v923_v21 = vmul.f32 0.5, %v922_v51 }
 0x169   : > { %v870_v25 = vmul.f32 0.03125, %v860_v50  ;;  %1552 = vmatmul.msk.bf16.gmra.mxu0 %vm988_vm7, %v961_v35  ;;  %1556 = vmatmul.msk.bf16.gmra.mxu1 %vm988_vm7, %v961_v35 }
 0x16a   : > { %1560 = vmatmul.msk.bf16.gmra.mxu2 %vm988_vm7, %v961_v35  ;;  %1564 = vmatmul.msk.bf16.gmra.mxu3 %vm988_vm7, %v961_v35  ;;  %v924_v0 = vsub.f32 1.5, %v923_v21 }
 0x16b   : > { %v1717_v52 = vpop.eup %1716  ;;  %v878_v58 = vadd.f32 1e-05, %v870_v25 }
 0x16c   : > { %v931_v61 = vmul.f32 %v1717_v52, %v877_v39  ;;  %v832_v15 = vpop.f32.mrf.mxu2  ;;  %v861_v2 = vpop.f32.mrf.mxu3  ;;  %v925_v20 = vmul.f32 %v1715_v34, %v924_v0  ;;  %vm937_vm15 = vweird.f32 %v1717_v52 }
 0x16d   : > { %1718 = vrsqrt.f32 %v878_v58  ;;  %v833_v53 = vadd.f32 %v832_v15, %v804_v57  ;;  %vm938_vm3 = vmor %vm936_vm2, %vm937_vm15  ;;  %vm946_vm6 = vweird.f32 %v878_v58 }
 0x16e   : > { %v932_v1 = vmul.f32 %v1717_v52, %v931_v61  ;;  %v929_v48 = vsel %vm928_vm1, %v1715_v34, %v925_v20 }
 0x16f   : > { %v862_v12 = vadd.f32 %v861_v2, %v833_v53 }
 0x170   : > { %v933_v13 = vmul.f32 0.5, %v932_v1 }
 0x171   : > { %v871_v14 = vmul.f32 0.03125, %v862_v12 }
 0x172   : > { %v934_v24 = vsub.f32 1.5, %v933_v13 }
 0x173   : > { %v1719_v38 = vpop.eup %1718  ;;  %v879_v44 = vadd.f32 1e-05, %v871_v14 }
 0x174   : > { %v935_v45 = vmul.f32 %v1717_v52, %v934_v24  ;;  %v941_v46 = vmul.f32 %v1719_v38, %v878_v58  ;;  %vm947_vm4 = vweird.f32 %v1719_v38  ;;  %v1149_v58 = vld [vmem:[%s2404_s4] sm:$0xf] }
 0x175   : > { %1720 = vrsqrt.f32 %v879_v44  ;;  %vm948_vm8 = vmor %vm946_vm6, %vm947_vm4  ;;  %vm956_vm9 = vweird.f32 %v879_v44  ;;  %v2255_v61 = vperm.slane %v1149_v58, 0  ;;  %v2257_v15 = vperm.slane %v1149_v58, 1 }
 0x176   : > { %v942_v47 = vmul.f32 %v1719_v38, %v941_v46  ;;  %v939_v51 = vsel %vm938_vm3, %v1717_v52, %v935_v45  ;;  %v2267_v14 = vperm.slane %v1149_v58, 2  ;;  %v2269_v20 = vperm.slane %v1149_v58, 3 }
 0x177   : > { %v962_v3 = vpack.c.bf16 %v939_v51, %v929_v48 }
 0x178   : > { %v943_v49 = vmul.f32 0.5, %v942_v47 }
 0x179   : > { %1553 = vmatmul.msk.bf16.gmra.mxu0 %vm988_vm7, %v962_v3  ;;  %1557 = vmatmul.msk.bf16.gmra.mxu1 %vm988_vm7, %v962_v3 }
 0x17a   : > { %1561 = vmatmul.msk.bf16.gmra.mxu2 %vm988_vm7, %v962_v3  ;;  %1565 = vmatmul.msk.bf16.gmra.mxu3 %vm988_vm7, %v962_v3  ;;  %v944_v35 = vsub.f32 1.5, %v943_v49 }
 0x17b   : > { %v1721_v56 = vpop.eup %1720 }
 0x17c   : > { %v951_v50 = vmul.f32 %v1721_v56, %v879_v44  ;;  %v945_v54 = vmul.f32 %v1719_v38, %v944_v35  ;;  %vm957_vm5 = vweird.f32 %v1721_v56 }
 0x17d   : > { %vm958_vm10 = vmor %vm956_vm9, %vm957_vm5 }
 0x17e   : > { %v952_v39 = vmul.f32 %v1721_v56, %v951_v50  ;;  %v949_v21 = vsel %vm948_vm8, %v1719_v38, %v945_v54 }
 0x180   : > { %v953_v55 = vmul.f32 0.5, %v952_v39 }
 0x182   : > { %v954_v34 = vsub.f32 1.5, %v953_v55 }
 0x184   : > { %v955_v25 = vmul.f32 %v1721_v56, %v954_v34 }
 0x186   : > { %v959_v52 = vsel %vm958_vm10, %v1721_v56, %v955_v25 }
 0x187   : > { %v963_v57 = vpack.c.bf16 %v959_v52, %v949_v21 }
 0x189   : > { %1554 = vmatmul.msk.bf16.gmra.mxu0 %vm988_vm7, %v963_v57  ;;  %1558 = vmatmul.msk.bf16.gmra.mxu1 %vm988_vm7, %v963_v57 }
 0x18a   : > { %1562 = vmatmul.msk.bf16.gmra.mxu2 %vm988_vm7, %v963_v57  ;;  %1566 = vmatmul.msk.bf16.gmra.mxu3 %vm988_vm7, %v963_v57 }
 0x1d6   : > { %v1010_v53 = vpop.f32.mrf.mxu0  ;;  %v1039_v0 = vpop.f32.mrf.mxu1 }
 0x1d7   : > { %v1117_v1 = vmul.f32 %v1010_v53, %v2064_v4  ;;  %v1118_v2 = vmul.f32 %v1039_v0, %v2066_v5 }
 0x1d9   : > { %v1159_v12 = vadd.f32 %v2255_v61, %v1117_v1  ;;  %v1160_v13 = vadd.f32 %v2257_v15, %v1118_v2 }
 0x1db   : > { %1191 = vst [vmem:[%s2263_s10] sm:$0xff] %v1159_v12 }
 0x1dc   : > { %1567 = vst [vmem:[%s2263_s10 + $0x8] sm:$0xff] %v1160_v13 }
 0x1dd   : > { %v1068_v4 = vpop.f32.mrf.mxu2  ;;  %v1097_v5 = vpop.f32.mrf.mxu3 }
 0x1de   : > { %v1119_v24 = vmul.f32 %v1068_v4, %v2072_v8  ;;  %v1120_v38 = vmul.f32 %v1097_v5, %v2074_v9  ;;  %v1012_v44 = vpop.f32.mrf.mxu0  ;;  %v1041_v45 = vpop.f32.mrf.mxu1 }
 0x1df   : > { %v1121_v46 = vmul.f32 %v1012_v44, %v2076_v10  ;;  %v1122_v47 = vmul.f32 %v1041_v45, %v2078_v11 }
 0x1e0   : > { %v1161_v48 = vadd.f32 %v2267_v14, %v1119_v24  ;;  %v1162_v51 = vadd.f32 %v2269_v20, %v1120_v38 }
 0x1e1   : > { %v1163_v3 = vadd.f32 %v2255_v61, %v1121_v46  ;;  %v1164_v49 = vadd.f32 %v2257_v15, %v1122_v47 }
 0x1e2   : > { %1568 = vst [vmem:[%s2263_s10 + $0x10] sm:$0xff] %v1161_v48 }
 0x1e3   : > { %1569 = vst [vmem:[%s2263_s10 + $0x18] sm:$0xff] %v1162_v51 }
 0x1e4   : > { %1570 = vst [vmem:[%s2263_s10 + $0x20] sm:$0xff] %v1163_v3 }
 0x1e5   : > { %1571 = vst [vmem:[%s2263_s10 + $0x28] sm:$0xff] %v1164_v49  ;;  %v1070_v8 = vpop.f32.mrf.mxu2  ;;  %v1099_v9 = vpop.f32.mrf.mxu3 }
 0x1e6   : > { %v1123_v10 = vmul.f32 %v1070_v8, %v2084_v16  ;;  %v1124_v11 = vmul.f32 %v1099_v9, %v2086_v17  ;;  %v1015_v56 = vpop.f32.mrf.mxu0  ;;  %v1044_v50 = vpop.f32.mrf.mxu1 }
 0x1e7   : > { %v1125_v35 = vmul.f32 %v1015_v56, %v2096_v22  ;;  %v1126_v39 = vmul.f32 %v1044_v50, %v2098_v23 }
 0x1e8   : > { %v1165_v55 = vadd.f32 %v2267_v14, %v1123_v10  ;;  %v1166_v54 = vadd.f32 %v2269_v20, %v1124_v11 }
 0x1e9   : > { %v1167_v34 = vadd.f32 %v2255_v61, %v1125_v35  ;;  %v1168_v25 = vadd.f32 %v2257_v15, %v1126_v39 }
 0x1ea   : > { %1572 = vst [vmem:[%s2263_s10 + $0x30] sm:$0xff] %v1165_v55 }
 0x1eb   : > { %1573 = vst [vmem:[%s2263_s10 + $0x38] sm:$0xff] %v1166_v54 }
 0x1ec   : > { %1574 = vst [vmem:[%s2263_s10 + $0x40] sm:$0xff] %v1167_v34 }
 0x1ed   : > { %1575 = vst [vmem:[%s2263_s10 + $0x48] sm:$0xff] %v1168_v25  ;;  %v1073_v16 = vpop.f32.mrf.mxu2  ;;  %v1102_v17 = vpop.f32.mrf.mxu3 }
 0x1ee   : > { %v1127_v22 = vmul.f32 %v1073_v16, %v2104_v28  ;;  %v1128_v23 = vmul.f32 %v1102_v17, %v2106_v29  ;;  %v1017_v21 = vpop.f32.mrf.mxu0  ;;  %v1046_v52 = vpop.f32.mrf.mxu1 }
 0x1ef   : > { %v1129_v57 = vmul.f32 %v1017_v21, %v2108_v30  ;;  %v1130_v58 = vmul.f32 %v1046_v52, %v2110_v31 }
 0x1f0   : > { %v1169_v53 = vadd.f32 %v2267_v14, %v1127_v22  ;;  %v1170_v0 = vadd.f32 %v2269_v20, %v1128_v23 }
 0x1f1   : > { %v1171_v1 = vadd.f32 %v2255_v61, %v1129_v57  ;;  %v1172_v2 = vadd.f32 %v2257_v15, %v1130_v58 }
 0x1f2   : > { %1576 = vst [vmem:[%s2263_s10 + $0x50] sm:$0xff] %v1169_v53 }
 0x1f3   : > { %1577 = vst [vmem:[%s2263_s10 + $0x58] sm:$0xff] %v1170_v0 }
 0x1f4   : > { %1578 = vst [vmem:[%s2263_s10 + $0x60] sm:$0xff] %v1171_v1 }
 0x1f5   : > { %1579 = vst [vmem:[%s2263_s10 + $0x68] sm:$0xff] %v1172_v2  ;;  %v1075_v28 = vpop.f32.mrf.mxu2  ;;  %v1104_v29 = vpop.f32.mrf.mxu3 }
 0x1f6   : > { %v1131_v30 = vmul.f32 %v1075_v28, %v2116_v36  ;;  %v1132_v31 = vmul.f32 %v1104_v29, %v2118_v37  ;;  %v1020_v12 = vpop.f32.mrf.mxu0  ;;  %v1049_v13 = vpop.f32.mrf.mxu1 }
 0x1f7   : > { %v1133_v4 = vmul.f32 %v1020_v12, %v2128_v42  ;;  %v1134_v5 = vmul.f32 %v1049_v13, %v2130_v43 }
 0x1f8   : > { %v1173_v24 = vadd.f32 %v2267_v14, %v1131_v30  ;;  %v1174_v38 = vadd.f32 %v2269_v20, %v1132_v31 }
 0x1f9   : > { %v1175_v44 = vadd.f32 %v2255_v61, %v1133_v4  ;;  %v1176_v45 = vadd.f32 %v2257_v15, %v1134_v5 }
 0x1fa   : > { %1580 = vst [vmem:[%s2263_s10 + $0x70] sm:$0xff] %v1173_v24 }
 0x1fb   : > { %1581 = vst [vmem:[%s2263_s10 + $0x78] sm:$0xff] %v1174_v38 }
 0x1fc   : > { %1582 = vst [vmem:[%s2263_s10 + $0x80] sm:$0xff] %v1175_v44 }
 0x1fd   : > { %1583 = vst [vmem:[%s2263_s10 + $0x88] sm:$0xff] %v1176_v45  ;;  %v1078_v36 = vpop.f32.mrf.mxu2  ;;  %v1107_v37 = vpop.f32.mrf.mxu3 }
 0x1fe   : > { %v1135_v42 = vmul.f32 %v1078_v36, %v2160_v59  ;;  %v1136_v43 = vmul.f32 %v1107_v37, %v2162_v60  ;;  %v1022_v46 = vpop.f32.mrf.mxu0  ;;  %v1051_v47 = vpop.f32.mrf.mxu1 }
 0x1ff   : > { %v1137_v48 = vmul.f32 %v1022_v46, %v2164_v62  ;;  %v1138_v51 = vmul.f32 %v1051_v47, %v2166_v63 }
 0x200   : > { %v1177_v3 = vadd.f32 %v2267_v14, %v1135_v42  ;;  %v1178_v49 = vadd.f32 %v2269_v20, %v1136_v43 }
 0x201   : > { %v1179_v8 = vadd.f32 %v2255_v61, %v1137_v48  ;;  %v1180_v9 = vadd.f32 %v2257_v15, %v1138_v51 }
 0x202   : > { %1584 = vst [vmem:[%s2263_s10 + $0x90] sm:$0xff] %v1177_v3 }
 0x203   : > { %1585 = vst [vmem:[%s2263_s10 + $0x98] sm:$0xff] %v1178_v49 }
 0x204   : > { %1586 = vst [vmem:[%s2263_s10 + $0xa0] sm:$0xff] %v1179_v8 }
 0x205   : > { %1587 = vst [vmem:[%s2263_s10 + $0xa8] sm:$0xff] %v1180_v9  ;;  %v1080_v59 = vpop.f32.mrf.mxu2  ;;  %v1109_v60 = vpop.f32.mrf.mxu3 }
 0x206   : > { %v1139_v62 = vmul.f32 %v1080_v59, %v2172_v6  ;;  %v1140_v63 = vmul.f32 %v1109_v60, %v2174_v7  ;;  %v1025_v10 = vpop.f32.mrf.mxu0  ;;  %v1054_v11 = vpop.f32.mrf.mxu1 }
 0x207   : > { %v1141_v56 = vmul.f32 %v1025_v10, %v2184_v18  ;;  %v1142_v50 = vmul.f32 %v1054_v11, %v2186_v19 }
 0x208   : > { %v1181_v35 = vadd.f32 %v2267_v14, %v1139_v62  ;;  %v1182_v39 = vadd.f32 %v2269_v20, %v1140_v63 }
 0x209   : > { %v1183_v55 = vadd.f32 %v2255_v61, %v1141_v56  ;;  %v1184_v54 = vadd.f32 %v2257_v15, %v1142_v50 }
 0x20a   : > { %1588 = vst [vmem:[%s2263_s10 + $0xb0] sm:$0xff] %v1181_v35 }
 0x20b   : > { %1589 = vst [vmem:[%s2263_s10 + $0xb8] sm:$0xff] %v1182_v39 }
 0x20c   : > { %1590 = vst [vmem:[%s2263_s10 + $0xc0] sm:$0xff] %v1183_v55 }
 0x20d   : > { %1591 = vst [vmem:[%s2263_s10 + $0xc8] sm:$0xff] %v1184_v54  ;;  %v1083_v6 = vpop.f32.mrf.mxu2  ;;  %v1112_v7 = vpop.f32.mrf.mxu3 }
 0x20e   : > { %v1143_v18 = vmul.f32 %v1083_v6, %v2192_v26  ;;  %v1144_v19 = vmul.f32 %v1112_v7, %v2194_v27  ;;  %v1027_v34 = vpop.f32.mrf.mxu0  ;;  %v1056_v25 = vpop.f32.mrf.mxu1 }
 0x20f   : > { %v1145_v16 = vmul.f32 %v1027_v34, %v2196_v32  ;;  %v1146_v17 = vmul.f32 %v1056_v25, %v2198_v33 }
 0x210   : > { %v1185_v22 = vadd.f32 %v2267_v14, %v1143_v18  ;;  %v1186_v23 = vadd.f32 %v2269_v20, %v1144_v19 }
 0x211   : > { %v1187_v21 = vadd.f32 %v2255_v61, %v1145_v16  ;;  %v1188_v52 = vadd.f32 %v2257_v15, %v1146_v17 }
 0x212   : > { %1592 = vst [vmem:[%s2263_s10 + $0xd0] sm:$0xff] %v1185_v22 }
 0x213   : > { %1593 = vst [vmem:[%s2263_s10 + $0xd8] sm:$0xff] %v1186_v23 }
 0x214   : > { %1594 = vst [vmem:[%s2263_s10 + $0xe0] sm:$0xff] %v1187_v21 }
 0x215   : > { %1595 = vst [vmem:[%s2263_s10 + $0xe8] sm:$0xff] %v1188_v52  ;;  %v1085_v26 = vpop.f32.mrf.mxu2  ;;  %v1114_v27 = vpop.f32.mrf.mxu3 }
 0x216   : > { %v1147_v32 = vmul.f32 %v1085_v26, %v2204_v40  ;;  %v1148_v33 = vmul.f32 %v1114_v27, %v2206_v41 }
 0x218   : > { %v1189_v61 = vadd.f32 %v2267_v14, %v1147_v32  ;;  %v1190_v15 = vadd.f32 %v2269_v20, %v1148_v33 }
 0x21a   : > { %1596 = vst [vmem:[%s2263_s10 + $0xf0] sm:$0xff] %v1189_v61 }
 0x21b   : > { %1597 = vst [vmem:[%s2263_s10 + $0xf8] sm:$0xff] %v1190_v15 }
 0x21c   : > { %1749 = shalt.err (!%p1746_p5)
}
 0x21d   : > { %s1802_s7 = smov 128   ;;  %s1803_s10 = smov 8  }
 0x21e   : > { %1649 = dma.vmem_to_hbm [thread:$0]  (%p1874_p4), %s1270_s21, 4096, %s1272_s16, %s1255_s17, %s1802_s7, %s1802_s7, %s1803_s10  }
 0x21f PF: > { %p1655_p6 = scmp.ge.s32.totalorder %s1800_s23, 2  ;;  %s1286_s11 = sand.u32 1, %s1780_s18  }
 0x220   : > { %s1287_s12 = scalar_lea.sflag [#allocation3], %s1286_s11 }
 0x221   : > { %p1652_p7 = pnand %p1655_p6, %p1881_p8 }
 0x223   : > { %p1653_p9 = pneg %p1652_p7 }
 0x225   : > { %1775 = dma.done.wait (%p1653_p9), %s1287_s12, 4096  }
 0x226   : > { %1777 = vsyncadd (%p1653_p9), %s1287_s12, 4294963200  ;;  %s18_s23 = sadd.s32 1, %s1800_s23   ;;  %s2408_s18 = smov %s1784_s19 }
 0x227   : > { %p15_p10 = scmp.ge.s32.totalorder %s18_s23, 4   ;;  %s2409_s19 = smov %s1788_s20 }
 0x228   : > { %s2410_s20 = smov %s1887_s6  ;;  %s2411_s21 = smov %s1796_s22 }
 0x229   : > { %s2412_s22 = smov %s2414_s26  ;;  %17 = sbr.rel (!%p15_p10) target bundleno = 4 (0x4), region = 106 }
 0x22e   :  { %1293 = vsyncpa [#allocation3], 1 }
 0x22f   :  { %1295 = vsyncpa [#allocation3 + $0x1], 1 }

</bundles_post_ra>
